<compile_context>
chip_gen: v7x
topology: tpu7x:2x2x1
jax: 0.10.0
libtpu: 0.0.40
codegen_flags: <defaults>
</compile_context>

<pallas_src>
import functools

import jax
import jax.numpy as jnp
import numpy as np
from jax import lax
from jax.experimental import pallas as pl
from jax.experimental.pallas import tpu as pltpu


DILATIONS = (1, 3, 5)
MXU_DTYPE = jnp.bfloat16


# ----------------------------- kernel helpers ------------------------------

def _elu(x):
    # ELU(alpha=1): x if x > 0 else exp(x) - 1   (computed in f32, overflow-safe)
    return jnp.where(x > 0, x, jnp.exp(jnp.minimum(x, 0.0)) - 1.0)


# -------------------------------- kernel -----------------------------------

def _decoder_block_kernel(u_ref, wt_ref, bt_ref,
                          wc1_ref, bc1_ref, wp1_ref, bp1_ref,
                          wc2_ref, bc2_ref, wp2_ref, bp2_ref,
                          wc3_ref, bc3_ref, wp3_ref, bp3_ref,
                          o_ref, tap_scr, y_scr, *, k_taps, dilations):
    g_blk, cout, lout = o_ref.shape          # G batch elems, out channels, time
    cin = u_ref.shape[1]
    d_max = max(dilations)
    seg = lout + 2 * d_max                    # per-batch segment: activation + halo

    # ---- ConvTranspose1d: fold all K taps into one bf16 (K*Cin, G*Lout) operand.
    # u_ref is the zero-stuffed, halo-padded bf16 input (G, Cin, Lout + K - 1);
    # tap k of output position t reads u_ext[:, t + (K-1-k)]  (static slices).
    for g in range(g_blk):
        for k in range(k_taps):
            tap_scr[pl.ds(k * cin, cin), pl.ds(g * lout, lout)] = \
                u_ref[g, :, pl.ds(k_taps - 1 - k, lout)]
    y = jnp.dot(wt_ref[...], tap_scr[pl.ds(0, k_taps * cin), :],
                preferred_element_type=jnp.float32)
    y = y + bt_ref[...]                                   # (Cout, G*Lout), f32

    # Zero only the per-batch right halos of y_scr; the body rewrites
    # [:, :lout] of each segment every residual unit, so the halo stays zero
    # (right-pad-with-zeros semantics of the dilated convs).
    for g in range(g_blk):
        y_scr[:, pl.ds(g * seg + lout, 2 * d_max)] = jnp.zeros(
            (cout, 2 * d_max), MXU_DTYPE)

    res = ((wc1_ref, bc1_ref, wp1_ref, bp1_ref),
           (wc2_ref, bc2_ref, wp2_ref, bp2_ref),
           (wc3_ref, bc3_ref, wp3_ref, bp3_ref))

    for (wc_ref, bc_ref, wp_ref, bp_ref), d in zip(res, dilations):
        v = _elu(y)                                       # f32 residual carry
        v16 = v.astype(MXU_DTYPE)
        for g in range(g_blk):                            # bf16 activation + halo
            y_scr[:, pl.ds(g * seg, lout)] = v16[:, g * lout:(g + 1) * lout]

        # dilated conv (kernel 3, right pad 2d): assemble bf16 (3*Cout, G*Lout)
        # tap operand from static lane slices of the zero-halo scratch.
        for g in range(g_blk):
            for k in range(3):
                tap_scr[pl.ds(k * cout, cout), pl.ds(g * lout, lout)] = \
                    y_scr[:, pl.ds(g * seg + k * d, lout)]
        h = jnp.dot(wc_ref[...], tap_scr[pl.ds(0, 3 * cout), :],
                    preferred_element_type=jnp.float32) + bc_ref[...]
        h = _elu(h)
        # pointwise (kernel 1) conv
        h = jnp.dot(wp_ref[...], h.astype(MXU_DTYPE),
                    preferred_element_type=jnp.float32) + bp_ref[...]
        y = v + h                                         # residual connection

    for g in range(g_blk):                                # NCW store
        o_ref[g, :, :] = y[:, g * lout:(g + 1) * lout].astype(o_ref.dtype)


# ------------------------- parameter preparation -----------------------------

def prepare_params(params):
    """Fuse/transpose/cast weights ONCE per parameter set (not per forward)."""
    wt, bt, res = params["wt"], params["bt"], params["res"]
    K, Cin, Cout = wt.shape
    prepped = {
        # (Cout, K*Cin) bf16:  [co, k*Cin + ci] = wt[k, ci, co]
        "wt": jnp.transpose(wt, (2, 0, 1)).reshape(Cout, K * Cin).astype(MXU_DTYPE),
        "bt": bt.reshape(Cout, 1).astype(jnp.float32),
        "res": [],
    }
    for (wc, bc, wp, bp) in res:
        prepped["res"].append((
            jnp.transpose(wc, (2, 0, 1)).reshape(Cout, 3 * Cout).astype(MXU_DTYPE),
            bc.reshape(Cout, 1).astype(jnp.float32),
            jnp.transpose(wp, (1, 0)).astype(MXU_DTYPE),
            bp.reshape(Cout, 1).astype(jnp.float32),
        ))
    return prepped


# ------------------------------- wrapper ------------------------------------

def decoder_block(x, prepped, *, stride, group=None):
    """x: (B, C_in, L) NCW f32, returns (B, C_out, L_out) NCW f32."""
    B, Cin, L = x.shape
    wt_f, bt = prepped["wt"], prepped["bt"]
    Cout, KCin = wt_f.shape
    K = KCin // Cin
    pad = stride // 2                       # = int(((2*1-1)*stride-1+1)/2)
    Lout = (L - 1) * stride - 2 * pad + K
    Lu = Lout + K - 1                       # halo-padded transconv input length
    left = K - 1 - pad
    d_max = max(DILATIONS)
    G = group if group is not None else B   # batch elements per grid step
    assert B % G == 0

    # glue: stride zero-stuffing + halo padding, bf16 (C, T) layout.
    # (In-kernel strided stuffing via pl.ds(start, size, stride) is the next
    #  step once strided lane stores are verified on all targets.)
    u = jnp.zeros((B, Cin, Lu), MXU_DTYPE)
    u = u.at[:, :, left: left + (L - 1) * stride + 1: stride].set(
        x.astype(MXU_DTYPE))

    inputs = [u, wt_f, bt]
    in_specs = [
        pl.BlockSpec((G, Cin, Lu), lambda b: (b, 0, 0)),
        pl.BlockSpec((Cout, KCin), lambda b: (0, 0)),
        pl.BlockSpec((Cout, 1), lambda b: (0, 0)),
    ]
    for (wc_f, bc, wp_f, bp) in prepped["res"]:
        inputs += [wc_f, bc, wp_f, bp]
        in_specs += [
            pl.BlockSpec((Cout, 3 * Cout), lambda b: (0, 0)),
            pl.BlockSpec((Cout, 1), lambda b: (0, 0)),
            pl.BlockSpec((Cout, Cout), lambda b: (0, 0)),
            pl.BlockSpec((Cout, 1), lambda b: (0, 0)),
        ]

    kernel = functools.partial(_decoder_block_kernel,
                               k_taps=K, dilations=DILATIONS)
    y = pl.pallas_call(
        kernel,
        out_shape=jax.ShapeDtypeStruct((B, Cout, Lout), jnp.float32),
        grid=(B // G,),
        in_specs=in_specs,
        out_specs=pl.BlockSpec((G, Cout, Lout), lambda b: (b, 0, 0)),
        scratch_shapes=[
            # fused-tap operand, shared by transconv and dilated convs (bf16)
            pltpu.VMEM((max(K * Cin, 3 * Cout), G * Lout), MXU_DTYPE),
            # ELU'd activation + per-batch zero halo (bf16)
            pltpu.VMEM((Cout, G * (Lout + 2 * d_max)), MXU_DTYPE),
        ],
        compiler_params=pltpu.CompilerParams(
            dimension_semantics=("parallel",),
            vmem_limit_bytes=32 * 1024 * 1024),
    )(*inputs)
    return y                                  # already NCW, no transpose needed


# ------------------------ deterministic parameters ---------------------------

def init_params(key, cin, cout, stride):
    K = 2 * stride if stride != 1 else 1
    keys = jax.random.split(key, 16)

    def xav(k, shape, fan_in, fan_out):
        bound = float(np.sqrt(6.0 / (fan_in + fan_out)))
        return jax.random.uniform(k, shape, jnp.float32, -bound, bound)

    params = {
        # wt[k, cin, cout] == pytorch ConvTranspose1d weight[cin, cout, k]
        "wt": xav(keys[0], (K, cin, cout), cin * K, cout * K),
        "bt": jax.random.uniform(keys[1], (1, cout), jnp.float32, -0.1, 0.1),
        "res": [],
    }
    ki = 2
    for _ in range(3):
        wc = xav(keys[ki], (3, cout, cout), cout * 3, cout * 3); ki += 1
        bc = jax.random.uniform(keys[ki], (1, cout), jnp.float32, -0.1, 0.1); ki += 1
        wp = xav(keys[ki], (cout, cout), cout, cout); ki += 1
        bp = jax.random.uniform(keys[ki], (1, cout), jnp.float32, -0.1, 0.1); ki += 1
        params["res"].append((wc, bc, wp, bp))
    return params


# ------------------------- pure-JAX reference --------------------------------

def reference_forward(x, params, *, stride):
    """Mirrors the PyTorch module (NCW, lax convolutions).  Conv operands are
    cast to bf16 with f32 accumulation, matching the kernel's MXU precision."""
    wt, bt, res = params["wt"], params["bt"], params["res"]
    K, _, Cout = wt.shape
    pad = stride // 2
    dn = ("NCH", "OIH", "NCH")
    bf = jnp.bfloat16

    # ConvTranspose1d == lhs-dilated conv with spatially flipped kernel
    w_conv = jnp.transpose(wt[::-1], (2, 1, 0)).astype(bf)       # (Cout, Cin, K)
    y = lax.conv_general_dilated(
        x.astype(bf), w_conv, window_strides=(1,),
        padding=[(K - 1 - pad, K - 1 - pad)],
        lhs_dilation=(stride,), dimension_numbers=dn,
        preferred_element_type=jnp.float32)
    y = y + bt.reshape(1, Cout, 1)

    for (wc, bc, wp, bp), d in zip(res, DILATIONS):
        y = jax.nn.elu(y)
        w1 = jnp.transpose(wc, (2, 1, 0)).astype(bf)             # (Cout, Cin, 3)
        h = lax.conv_general_dilated(
            y.astype(bf), w1, window_strides=(1,), padding=[(0, 2 * d)],
            rhs_dilation=(d,), dimension_numbers=dn,
            preferred_element_type=jnp.float32)
        h = h + bc.reshape(1, Cout, 1)
        h = jax.nn.elu(h)
        w2 = jnp.transpose(wp, (1, 0))[:, :, None].astype(bf)    # (Cout, Cin, 1)
        h = lax.conv_general_dilated(
            h.astype(bf), w2, window_strides=(1,), padding=[(0, 0)],
            dimension_numbers=dn, preferred_element_type=jnp.float32)
        h = h + bp.reshape(1, Cout, 1)
        y = y + h
    return y


# --------------------------------- main ---------------------------------------

if __name__ == "__main__":
    key = jax.random.PRNGKey(0)
    k_x, k_p = jax.random.split(key)

    B, Cin, Cout, L, stride = 4, 4, 8, 16, 2        # kernel = 2*stride = 4
    G = 2                                           # batch elems per grid step
    x = jax.random.normal(k_x, (B, Cin, L), jnp.float32)
    params = init_params(k_p, Cin, Cout, stride)
    prepped = prepare_params(params)                # fused weights, built once

    fwd = jax.jit(functools.partial(decoder_block, stride=stride, group=G))
    out = jax.block_until_ready(fwd(x, prepped))    # (B, Cout, 2*L) NCW

    ref = reference_forward(x, params, stride=stride)
    np.testing.assert_allclose(np.asarray(out), np.asarray(ref),
                               rtol=2e-3, atol=2e-3)
    print("KERNEL_OK")
</pallas_src>

<mosaic_0001>
module attributes {stable_mosaic.version = 11 : i64} {
  func.func @_decoder_block_kernel(%arg0: i32, %arg1: memref<2x4x35xbf16, #tpu.memory_space<vmem>>, %arg2: memref<8x16xbf16, #tpu.memory_space<vmem>>, %arg3: memref<8x1xf32, #tpu.memory_space<vmem>>, %arg4: memref<8x24xbf16, #tpu.memory_space<vmem>>, %arg5: memref<8x1xf32, #tpu.memory_space<vmem>>, %arg6: memref<8x8xbf16, #tpu.memory_space<vmem>>, %arg7: memref<8x1xf32, #tpu.memory_space<vmem>>, %arg8: memref<8x24xbf16, #tpu.memory_space<vmem>>, %arg9: memref<8x1xf32, #tpu.memory_space<vmem>>, %arg10: memref<8x8xbf16, #tpu.memory_space<vmem>>, %arg11: memref<8x1xf32, #tpu.memory_space<vmem>>, %arg12: memref<8x24xbf16, #tpu.memory_space<vmem>>, %arg13: memref<8x1xf32, #tpu.memory_space<vmem>>, %arg14: memref<8x8xbf16, #tpu.memory_space<vmem>>, %arg15: memref<8x1xf32, #tpu.memory_space<vmem>>, %arg16: memref<2x8x32xf32, #tpu.memory_space<vmem>>, %arg17: memref<24x64xbf16, #tpu.memory_space<vmem>>, %arg18: memref<8x84xbf16, #tpu.memory_space<vmem>>) attributes {dimension_semantics = [#tpu.dimension_semantics<parallel>], iteration_bounds = array<i64: 2>, scalar_prefetch = 0 : i64, scratch_operands = 2 : i64, tpu.core_type = #tpu.core_type<tc>, window_params = [{transform_indices = @transform_0, window_bounds = array<i64: 2, 4, 35>}, {pipeline_mode = #tpu.pipeline_mode<synchronous>, transform_indices = @transform_1, window_bounds = array<i64: 8, 16>}, {pipeline_mode = #tpu.pipeline_mode<synchronous>, transform_indices = @transform_2, window_bounds = array<i64: 8, 1>}, {pipeline_mode = #tpu.pipeline_mode<synchronous>, transform_indices = @transform_3, window_bounds = array<i64: 8, 24>}, {pipeline_mode = #tpu.pipeline_mode<synchronous>, transform_indices = @transform_4, window_bounds = array<i64: 8, 1>}, {pipeline_mode = #tpu.pipeline_mode<synchronous>, transform_indices = @transform_5, window_bounds = array<i64: 8, 8>}, {pipeline_mode = #tpu.pipeline_mode<synchronous>, transform_indices = @transform_6, window_bounds = array<i64: 8, 1>}, {pipeline_mode = #tpu.pipeline_mode<synchronous>, transform_indices = @transform_7, window_bounds = array<i64: 8, 24>}, {pipeline_mode = #tpu.pipeline_mode<synchronous>, transform_indices = @transform_8, window_bounds = array<i64: 8, 1>}, {pipeline_mode = #tpu.pipeline_mode<synchronous>, transform_indices = @transform_9, window_bounds = array<i64: 8, 8>}, {pipeline_mode = #tpu.pipeline_mode<synchronous>, transform_indices = @transform_10, window_bounds = array<i64: 8, 1>}, {pipeline_mode = #tpu.pipeline_mode<synchronous>, transform_indices = @transform_11, window_bounds = array<i64: 8, 24>}, {pipeline_mode = #tpu.pipeline_mode<synchronous>, transform_indices = @transform_12, window_bounds = array<i64: 8, 1>}, {pipeline_mode = #tpu.pipeline_mode<synchronous>, transform_indices = @transform_13, window_bounds = array<i64: 8, 8>}, {pipeline_mode = #tpu.pipeline_mode<synchronous>, transform_indices = @transform_14, window_bounds = array<i64: 8, 1>}, {transform_indices = @transform_15, window_bounds = array<i64: 2, 8, 32>}]} {
    %c0 = arith.constant 0 : index
    %c0_0 = arith.constant 0 : index
    %c3 = arith.constant 3 : index
    %0 = vector.load %arg1[%c0, %c0_0, %c3] : memref<2x4x35xbf16, #tpu.memory_space<vmem>>, vector<1x4x32xbf16>
    %1 = vector.shape_cast %0 : vector<1x4x32xbf16> to vector<4x32xbf16>
    %c0_1 = arith.constant 0 : index
    %c0_2 = arith.constant 0 : index
    %2 = vector.load %arg17[%c0_1, %c0_2] : memref<24x64xbf16, #tpu.memory_space<vmem>>, vector<4x32xbf16>
    tpu.vector_store %arg17[%c0_1, %c0_2], %1 {strides = array<i32>} : memref<24x64xbf16, #tpu.memory_space<vmem>>, vector<4x32xbf16>,
    %c0_3 = arith.constant 0 : index
    %c0_4 = arith.constant 0 : index
    %c2 = arith.constant 2 : index
    %3 = vector.load %arg1[%c0_3, %c0_4, %c2] : memref<2x4x35xbf16, #tpu.memory_space<vmem>>, vector<1x4x32xbf16>
    %4 = vector.shape_cast %3 : vector<1x4x32xbf16> to vector<4x32xbf16>
    %c4 = arith.constant 4 : index
    %c0_5 = arith.constant 0 : index
    %5 = vector.load %arg17[%c4, %c0_5] : memref<24x64xbf16, #tpu.memory_space<vmem>>, vector<4x32xbf16>
    tpu.vector_store %arg17[%c4, %c0_5], %4 {strides = array<i32>} : memref<24x64xbf16, #tpu.memory_space<vmem>>, vector<4x32xbf16>,
    %c0_6 = arith.constant 0 : index
    %c0_7 = arith.constant 0 : index
    %c1 = arith.constant 1 : index
    %6 = vector.load %arg1[%c0_6, %c0_7, %c1] : memref<2x4x35xbf16, #tpu.memory_space<vmem>>, vector<1x4x32xbf16>
    %7 = vector.shape_cast %6 : vector<1x4x32xbf16> to vector<4x32xbf16>
    %c8 = arith.constant 8 : index
    %c0_8 = arith.constant 0 : index
    %8 = vector.load %arg17[%c8, %c0_8] : memref<24x64xbf16, #tpu.memory_space<vmem>>, vector<4x32xbf16>
    tpu.vector_store %arg17[%c8, %c0_8], %7 {strides = array<i32>} : memref<24x64xbf16, #tpu.memory_space<vmem>>, vector<4x32xbf16>,
    %c0_9 = arith.constant 0 : index
    %c0_10 = arith.constant 0 : index
    %c0_11 = arith.constant 0 : index
    %9 = vector.load %arg1[%c0_9, %c0_10, %c0_11] : memref<2x4x35xbf16, #tpu.memory_space<vmem>>, vector<1x4x32xbf16>
    %10 = vector.shape_cast %9 : vector<1x4x32xbf16> to vector<4x32xbf16>
    %c12 = arith.constant 12 : index
    %c0_12 = arith.constant 0 : index
    %11 = vector.load %arg17[%c12, %c0_12] : memref<24x64xbf16, #tpu.memory_space<vmem>>, vector<4x32xbf16>
    tpu.vector_store %arg17[%c12, %c0_12], %10 {strides = array<i32>} : memref<24x64xbf16, #tpu.memory_space<vmem>>, vector<4x32xbf16>,
    %c1_13 = arith.constant 1 : index
    %c0_14 = arith.constant 0 : index
    %c3_15 = arith.constant 3 : index
    %12 = vector.load %arg1[%c1_13, %c0_14, %c3_15] : memref<2x4x35xbf16, #tpu.memory_space<vmem>>, vector<1x4x32xbf16>
    %13 = vector.shape_cast %12 : vector<1x4x32xbf16> to vector<4x32xbf16>
    %c0_16 = arith.constant 0 : index
    %c32 = arith.constant 32 : index
    %14 = vector.load %arg17[%c0_16, %c32] : memref<24x64xbf16, #tpu.memory_space<vmem>>, vector<4x32xbf16>
    tpu.vector_store %arg17[%c0_16, %c32], %13 {strides = array<i32>} : memref<24x64xbf16, #tpu.memory_space<vmem>>, vector<4x32xbf16>,
    %c1_17 = arith.constant 1 : index
    %c0_18 = arith.constant 0 : index
    %c2_19 = arith.constant 2 : index
    %15 = vector.load %arg1[%c1_17, %c0_18, %c2_19] : memref<2x4x35xbf16, #tpu.memory_space<vmem>>, vector<1x4x32xbf16>
    %16 = vector.shape_cast %15 : vector<1x4x32xbf16> to vector<4x32xbf16>
    %c4_20 = arith.constant 4 : index
    %c32_21 = arith.constant 32 : index
    %17 = vector.load %arg17[%c4_20, %c32_21] : memref<24x64xbf16, #tpu.memory_space<vmem>>, vector<4x32xbf16>
    tpu.vector_store %arg17[%c4_20, %c32_21], %16 {strides = array<i32>} : memref<24x64xbf16, #tpu.memory_space<vmem>>, vector<4x32xbf16>,
    %c1_22 = arith.constant 1 : index
    %c0_23 = arith.constant 0 : index
    %c1_24 = arith.constant 1 : index
    %18 = vector.load %arg1[%c1_22, %c0_23, %c1_24] : memref<2x4x35xbf16, #tpu.memory_space<vmem>>, vector<1x4x32xbf16>
    %19 = vector.shape_cast %18 : vector<1x4x32xbf16> to vector<4x32xbf16>
    %c8_25 = arith.constant 8 : index
    %c32_26 = arith.constant 32 : index
    %20 = vector.load %arg17[%c8_25, %c32_26] : memref<24x64xbf16, #tpu.memory_space<vmem>>, vector<4x32xbf16>
    tpu.vector_store %arg17[%c8_25, %c32_26], %19 {strides = array<i32>} : memref<24x64xbf16, #tpu.memory_space<vmem>>, vector<4x32xbf16>,
    %c1_27 = arith.constant 1 : index
    %c0_28 = arith.constant 0 : index
    %c0_29 = arith.constant 0 : index
    %21 = vector.load %arg1[%c1_27, %c0_28, %c0_29] : memref<2x4x35xbf16, #tpu.memory_space<vmem>>, vector<1x4x32xbf16>
    %22 = vector.shape_cast %21 : vector<1x4x32xbf16> to vector<4x32xbf16>
    %c12_30 = arith.constant 12 : index
    %c32_31 = arith.constant 32 : index
    %23 = vector.load %arg17[%c12_30, %c32_31] : memref<24x64xbf16, #tpu.memory_space<vmem>>, vector<4x32xbf16>
    tpu.vector_store %arg17[%c12_30, %c32_31], %22 {strides = array<i32>} : memref<24x64xbf16, #tpu.memory_space<vmem>>, vector<4x32xbf16>,
    %c0_32 = arith.constant 0 : index
    %c0_33 = arith.constant 0 : index
    %24 = vector.load %arg2[%c0_32, %c0_33] : memref<8x16xbf16, #tpu.memory_space<vmem>>, vector<8x16xbf16>
    %c0_34 = arith.constant 0 : index
    %c0_35 = arith.constant 0 : index
    %25 = vector.load %arg17[%c0_34, %c0_35] : memref<24x64xbf16, #tpu.memory_space<vmem>>, vector<16x64xbf16>
    %cst = arith.constant dense<0.000000e+00> : vector<8x64xf32>
    %26 = tpu.matmul %24, %25, %cst {dimension_numbers = #tpu.dot_dimension_numbers<[1], [0], [0], [1], [0, 0, 1, 1], [], []>} : vector<8x16xbf16>, vector<16x64xbf16>, vector<8x64xf32> -> vector<8x64xf32>
    %c0_36 = arith.constant 0 : index
    %c0_37 = arith.constant 0 : index
    %27 = vector.load %arg3[%c0_36, %c0_37] : memref<8x1xf32, #tpu.memory_space<vmem>>, vector<8x1xf32>
    %28 = vector.broadcast %27 : vector<8x1xf32> to vector<8x64xf32>
    %29 = arith.addf %26, %28 : vector<8x64xf32>
    %cst_38 = arith.constant 0.000000e+00 : bf16
    %30 = vector.broadcast %cst_38 : bf16 to vector<8x10xbf16>
    %c0_39 = arith.constant 0 : index
    %c32_40 = arith.constant 32 : index
    %31 = vector.load %arg18[%c0_39, %c32_40] : memref<8x84xbf16, #tpu.memory_space<vmem>>, vector<8x10xbf16>
    tpu.vector_store %arg18[%c0_39, %c32_40], %30 {strides = array<i32>} : memref<8x84xbf16, #tpu.memory_space<vmem>>, vector<8x10xbf16>,
    %cst_41 = arith.constant 0.000000e+00 : bf16
    %32 = vector.broadcast %cst_41 : bf16 to vector<8x10xbf16>
    %c0_42 = arith.constant 0 : index
    %c74 = arith.constant 74 : index
    %33 = vector.load %arg18[%c0_42, %c74] : memref<8x84xbf16, #tpu.memory_space<vmem>>, vector<8x10xbf16>
    tpu.vector_store %arg18[%c0_42, %c74], %32 {strides = array<i32>} : memref<8x84xbf16, #tpu.memory_space<vmem>>, vector<8x10xbf16>,
    %cst_43 = arith.constant 0.000000e+00 : f32
    %34 = vector.broadcast %cst_43 : f32 to vector<8x64xf32>
    %35 = arith.cmpf ogt, %29, %34 : vector<8x64xf32>
    %cst_44 = arith.constant 0.000000e+00 : f32
    %36 = vector.broadcast %cst_44 : f32 to vector<8x64xf32>
    %37 = arith.minimumf %29, %36 : vector<8x64xf32>
    %38 = math.exp %37 : vector<8x64xf32>
    %cst_45 = arith.constant 1.000000e+00 : f32
    %39 = vector.broadcast %cst_45 : f32 to vector<8x64xf32>
    %40 = arith.subf %38, %39 : vector<8x64xf32>
    %41 = arith.select %35, %29, %40 : vector<8x64xi1>, vector<8x64xf32>
    %42 = arith.truncf %41 : vector<8x64xf32> to vector<8x64xbf16>
    %43 = vector.extract_strided_slice %42 {offsets = [0, 0], sizes = [8, 32], strides = [1, 1]} : vector<8x64xbf16> to vector<8x32xbf16>
    %c0_46 = arith.constant 0 : index
    %c0_47 = arith.constant 0 : index
    %44 = vector.load %arg18[%c0_46, %c0_47] : memref<8x84xbf16, #tpu.memory_space<vmem>>, vector<8x32xbf16>
    tpu.vector_store %arg18[%c0_46, %c0_47], %43 {strides = array<i32>} : memref<8x84xbf16, #tpu.memory_space<vmem>>, vector<8x32xbf16>,
    %45 = vector.extract_strided_slice %42 {offsets = [0, 32], sizes = [8, 32], strides = [1, 1]} : vector<8x64xbf16> to vector<8x32xbf16>
    %c0_48 = arith.constant 0 : index
    %c42 = arith.constant 42 : index
    %46 = vector.load %arg18[%c0_48, %c42] : memref<8x84xbf16, #tpu.memory_space<vmem>>, vector<8x32xbf16>
    tpu.vector_store %arg18[%c0_48, %c42], %45 {strides = array<i32>} : memref<8x84xbf16, #tpu.memory_space<vmem>>, vector<8x32xbf16>,
    %c0_49 = arith.constant 0 : index
    %c0_50 = arith.constant 0 : index
    %47 = vector.load %arg18[%c0_49, %c0_50] : memref<8x84xbf16, #tpu.memory_space<vmem>>, vector<8x32xbf16>
    %c0_51 = arith.constant 0 : index
    %c0_52 = arith.constant 0 : index
    %48 = vector.load %arg17[%c0_51, %c0_52] : memref<24x64xbf16, #tpu.memory_space<vmem>>, vector<8x32xbf16>
    tpu.vector_store %arg17[%c0_51, %c0_52], %47 {strides = array<i32>} : memref<24x64xbf16, #tpu.memory_space<vmem>>, vector<8x32xbf16>,
    %c0_53 = arith.constant 0 : index
    %c1_54 = arith.constant 1 : index
    %49 = vector.load %arg18[%c0_53, %c1_54] : memref<8x84xbf16, #tpu.memory_space<vmem>>, vector<8x32xbf16>
    %c8_55 = arith.constant 8 : index
    %c0_56 = arith.constant 0 : index
    %50 = vector.load %arg17[%c8_55, %c0_56] : memref<24x64xbf16, #tpu.memory_space<vmem>>, vector<8x32xbf16>
    tpu.vector_store %arg17[%c8_55, %c0_56], %49 {strides = array<i32>} : memref<24x64xbf16, #tpu.memory_space<vmem>>, vector<8x32xbf16>,
    %c0_57 = arith.constant 0 : index
    %c2_58 = arith.constant 2 : index
    %51 = vector.load %arg18[%c0_57, %c2_58] : memref<8x84xbf16, #tpu.memory_space<vmem>>, vector<8x32xbf16>
    %c16 = arith.constant 16 : index
    %c0_59 = arith.constant 0 : index
    %52 = vector.load %arg17[%c16, %c0_59] : memref<24x64xbf16, #tpu.memory_space<vmem>>, vector<8x32xbf16>
    tpu.vector_store %arg17[%c16, %c0_59], %51 {strides = array<i32>} : memref<24x64xbf16, #tpu.memory_space<vmem>>, vector<8x32xbf16>,
    %c0_60 = arith.constant 0 : index
    %c42_61 = arith.constant 42 : index
    %53 = vector.load %arg18[%c0_60, %c42_61] : memref<8x84xbf16, #tpu.memory_space<vmem>>, vector<8x32xbf16>
    %c0_62 = arith.constant 0 : index
    %c32_63 = arith.constant 32 : index
    %54 = vector.load %arg17[%c0_62, %c32_63] : memref<24x64xbf16, #tpu.memory_space<vmem>>, vector<8x32xbf16>
    tpu.vector_store %arg17[%c0_62, %c32_63], %53 {strides = array<i32>} : memref<24x64xbf16, #tpu.memory_space<vmem>>, vector<8x32xbf16>,
    %c0_64 = arith.constant 0 : index
    %c43 = arith.constant 43 : index
    %55 = vector.load %arg18[%c0_64, %c43] : memref<8x84xbf16, #tpu.memory_space<vmem>>, vector<8x32xbf16>
    %c8_65 = arith.constant 8 : index
    %c32_66 = arith.constant 32 : index
    %56 = vector.load %arg17[%c8_65, %c32_66] : memref<24x64xbf16, #tpu.memory_space<vmem>>, vector<8x32xbf16>
    tpu.vector_store %arg17[%c8_65, %c32_66], %55 {strides = array<i32>} : memref<24x64xbf16, #tpu.memory_space<vmem>>, vector<8x32xbf16>,
    %c0_67 = arith.constant 0 : index
    %c44 = arith.constant 44 : index
    %57 = vector.load %arg18[%c0_67, %c44] : memref<8x84xbf16, #tpu.memory_space<vmem>>, vector<8x32xbf16>
    %c16_68 = arith.constant 16 : index
    %c32_69 = arith.constant 32 : index
    %58 = vector.load %arg17[%c16_68, %c32_69] : memref<24x64xbf16, #tpu.memory_space<vmem>>, vector<8x32xbf16>
    tpu.vector_store %arg17[%c16_68, %c32_69], %57 {strides = array<i32>} : memref<24x64xbf16, #tpu.memory_space<vmem>>, vector<8x32xbf16>,
    %c0_70 = arith.constant 0 : index
    %c0_71 = arith.constant 0 : index
    %59 = vector.load %arg4[%c0_70, %c0_71] : memref<8x24xbf16, #tpu.memory_space<vmem>>, vector<8x24xbf16>
    %c0_72 = arith.constant 0 : index
    %c0_73 = arith.constant 0 : index
    %60 = vector.load %arg17[%c0_72, %c0_73] : memref<24x64xbf16, #tpu.memory_space<vmem>>, vector<24x64xbf16>
    %cst_74 = arith.constant dense<0.000000e+00> : vector<8x64xf32>
    %61 = tpu.matmul %59, %60, %cst_74 {dimension_numbers = #tpu.dot_dimension_numbers<[1], [0], [0], [1], [0, 0, 1, 1], [], []>} : vector<8x24xbf16>, vector<24x64xbf16>, vector<8x64xf32> -> vector<8x64xf32>
    %c0_75 = arith.constant 0 : index
    %c0_76 = arith.constant 0 : index
    %62 = vector.load %arg5[%c0_75, %c0_76] : memref<8x1xf32, #tpu.memory_space<vmem>>, vector<8x1xf32>
    %63 = vector.broadcast %62 : vector<8x1xf32> to vector<8x64xf32>
    %64 = arith.addf %61, %63 : vector<8x64xf32>
    %cst_77 = arith.constant 0.000000e+00 : f32
    %65 = vector.broadcast %cst_77 : f32 to vector<8x64xf32>
    %66 = arith.cmpf ogt, %64, %65 : vector<8x64xf32>
    %cst_78 = arith.constant 0.000000e+00 : f32
    %67 = vector.broadcast %cst_78 : f32 to vector<8x64xf32>
    %68 = arith.minimumf %64, %67 : vector<8x64xf32>
    %69 = math.exp %68 : vector<8x64xf32>
    %cst_79 = arith.constant 1.000000e+00 : f32
    %70 = vector.broadcast %cst_79 : f32 to vector<8x64xf32>
    %71 = arith.subf %69, %70 : vector<8x64xf32>
    %72 = arith.select %66, %64, %71 : vector<8x64xi1>, vector<8x64xf32>
    %c0_80 = arith.constant 0 : index
    %c0_81 = arith.constant 0 : index
    %73 = vector.load %arg6[%c0_80, %c0_81] : memref<8x8xbf16, #tpu.memory_space<vmem>>, vector<8x8xbf16>
    %74 = arith.truncf %72 : vector<8x64xf32> to vector<8x64xbf16>
    %cst_82 = arith.constant dense<0.000000e+00> : vector<8x64xf32>
    %75 = tpu.matmul %73, %74, %cst_82 {dimension_numbers = #tpu.dot_dimension_numbers<[1], [0], [0], [1], [0, 0, 1, 1], [], []>} : vector<8x8xbf16>, vector<8x64xbf16>, vector<8x64xf32> -> vector<8x64xf32>
    %c0_83 = arith.constant 0 : index
    %c0_84 = arith.constant 0 : index
    %76 = vector.load %arg7[%c0_83, %c0_84] : memref<8x1xf32, #tpu.memory_space<vmem>>, vector<8x1xf32>
    %77 = vector.broadcast %76 : vector<8x1xf32> to vector<8x64xf32>
    %78 = arith.addf %75, %77 : vector<8x64xf32>
    %79 = arith.addf %41, %78 : vector<8x64xf32>
    %cst_85 = arith.constant 0.000000e+00 : f32
    %80 = vector.broadcast %cst_85 : f32 to vector<8x64xf32>
    %81 = arith.cmpf ogt, %79, %80 : vector<8x64xf32>
    %cst_86 = arith.constant 0.000000e+00 : f32
    %82 = vector.broadcast %cst_86 : f32 to vector<8x64xf32>
    %83 = arith.minimumf %79, %82 : vector<8x64xf32>
    %84 = math.exp %83 : vector<8x64xf32>
    %cst_87 = arith.constant 1.000000e+00 : f32
    %85 = vector.broadcast %cst_87 : f32 to vector<8x64xf32>
    %86 = arith.subf %84, %85 : vector<8x64xf32>
    %87 = arith.select %81, %79, %86 : vector<8x64xi1>, vector<8x64xf32>
    %88 = arith.truncf %87 : vector<8x64xf32> to vector<8x64xbf16>
    %89 = vector.extract_strided_slice %88 {offsets = [0, 0], sizes = [8, 32], strides = [1, 1]} : vector<8x64xbf16> to vector<8x32xbf16>
    %c0_88 = arith.constant 0 : index
    %c0_89 = arith.constant 0 : index
    %90 = vector.load %arg18[%c0_88, %c0_89] : memref<8x84xbf16, #tpu.memory_space<vmem>>, vector<8x32xbf16>
    tpu.vector_store %arg18[%c0_88, %c0_89], %89 {strides = array<i32>} : memref<8x84xbf16, #tpu.memory_space<vmem>>, vector<8x32xbf16>,
    %91 = vector.extract_strided_slice %88 {offsets = [0, 32], sizes = [8, 32], strides = [1, 1]} : vector<8x64xbf16> to vector<8x32xbf16>
    %c0_90 = arith.constant 0 : index
    %c42_91 = arith.constant 42 : index
    %92 = vector.load %arg18[%c0_90, %c42_91] : memref<8x84xbf16, #tpu.memory_space<vmem>>, vector<8x32xbf16>
    tpu.vector_store %arg18[%c0_90, %c42_91], %91 {strides = array<i32>} : memref<8x84xbf16, #tpu.memory_space<vmem>>, vector<8x32xbf16>,
    %c0_92 = arith.constant 0 : index
    %c0_93 = arith.constant 0 : index
    %93 = vector.load %arg18[%c0_92, %c0_93] : memref<8x84xbf16, #tpu.memory_space<vmem>>, vector<8x32xbf16>
    %c0_94 = arith.constant 0 : index
    %c0_95 = arith.constant 0 : index
    %94 = vector.load %arg17[%c0_94, %c0_95] : memref<24x64xbf16, #tpu.memory_space<vmem>>, vector<8x32xbf16>
    tpu.vector_store %arg17[%c0_94, %c0_95], %93 {strides = array<i32>} : memref<24x64xbf16, #tpu.memory_space<vmem>>, vector<8x32xbf16>,
    %c0_96 = arith.constant 0 : index
    %c3_97 = arith.constant 3 : index
    %95 = vector.load %arg18[%c0_96, %c3_97] : memref<8x84xbf16, #tpu.memory_space<vmem>>, vector<8x32xbf16>
    %c8_98 = arith.constant 8 : index
    %c0_99 = arith.constant 0 : index
    %96 = vector.load %arg17[%c8_98, %c0_99] : memref<24x64xbf16, #tpu.memory_space<vmem>>, vector<8x32xbf16>
    tpu.vector_store %arg17[%c8_98, %c0_99], %95 {strides = array<i32>} : memref<24x64xbf16, #tpu.memory_space<vmem>>, vector<8x32xbf16>,
    %c0_100 = arith.constant 0 : index
    %c6 = arith.constant 6 : index
    %97 = vector.load %arg18[%c0_100, %c6] : memref<8x84xbf16, #tpu.memory_space<vmem>>, vector<8x32xbf16>
    %c16_101 = arith.constant 16 : index
    %c0_102 = arith.constant 0 : index
    %98 = vector.load %arg17[%c16_101, %c0_102] : memref<24x64xbf16, #tpu.memory_space<vmem>>, vector<8x32xbf16>
    tpu.vector_store %arg17[%c16_101, %c0_102], %97 {strides = array<i32>} : memref<24x64xbf16, #tpu.memory_space<vmem>>, vector<8x32xbf16>,
    %c0_103 = arith.constant 0 : index
    %c42_104 = arith.constant 42 : index
    %99 = vector.load %arg18[%c0_103, %c42_104] : memref<8x84xbf16, #tpu.memory_space<vmem>>, vector<8x32xbf16>
    %c0_105 = arith.constant 0 : index
    %c32_106 = arith.constant 32 : index
    %100 = vector.load %arg17[%c0_105, %c32_106] : memref<24x64xbf16, #tpu.memory_space<vmem>>, vector<8x32xbf16>
    tpu.vector_store %arg17[%c0_105, %c32_106], %99 {strides = array<i32>} : memref<24x64xbf16, #tpu.memory_space<vmem>>, vector<8x32xbf16>,
    %c0_107 = arith.constant 0 : index
    %c45 = arith.constant 45 : index
    %101 = vector.load %arg18[%c0_107, %c45] : memref<8x84xbf16, #tpu.memory_space<vmem>>, vector<8x32xbf16>
    %c8_108 = arith.constant 8 : index
    %c32_109 = arith.constant 32 : index
    %102 = vector.load %arg17[%c8_108, %c32_109] : memref<24x64xbf16, #tpu.memory_space<vmem>>, vector<8x32xbf16>
    tpu.vector_store %arg17[%c8_108, %c32_109], %101 {strides = array<i32>} : memref<24x64xbf16, #tpu.memory_space<vmem>>, vector<8x32xbf16>,
    %c0_110 = arith.constant 0 : index
    %c48 = arith.constant 48 : index
    %103 = vector.load %arg18[%c0_110, %c48] : memref<8x84xbf16, #tpu.memory_space<vmem>>, vector<8x32xbf16>
    %c16_111 = arith.constant 16 : index
    %c32_112 = arith.constant 32 : index
    %104 = vector.load %arg17[%c16_111, %c32_112] : memref<24x64xbf16, #tpu.memory_space<vmem>>, vector<8x32xbf16>
    tpu.vector_store %arg17[%c16_111, %c32_112], %103 {strides = array<i32>} : memref<24x64xbf16, #tpu.memory_space<vmem>>, vector<8x32xbf16>,
    %c0_113 = arith.constant 0 : index
    %c0_114 = arith.constant 0 : index
    %105 = vector.load %arg8[%c0_113, %c0_114] : memref<8x24xbf16, #tpu.memory_space<vmem>>, vector<8x24xbf16>
    %c0_115 = arith.constant 0 : index
    %c0_116 = arith.constant 0 : index
    %106 = vector.load %arg17[%c0_115, %c0_116] : memref<24x64xbf16, #tpu.memory_space<vmem>>, vector<24x64xbf16>
    %cst_117 = arith.constant dense<0.000000e+00> : vector<8x64xf32>
    %107 = tpu.matmul %105, %106, %cst_117 {dimension_numbers = #tpu.dot_dimension_numbers<[1], [0], [0], [1], [0, 0, 1, 1], [], []>} : vector<8x24xbf16>, vector<24x64xbf16>, vector<8x64xf32> -> vector<8x64xf32>
    %c0_118 = arith.constant 0 : index
    %c0_119 = arith.constant 0 : index
    %108 = vector.load %arg9[%c0_118, %c0_119] : memref<8x1xf32, #tpu.memory_space<vmem>>, vector<8x1xf32>
    %109 = vector.broadcast %108 : vector<8x1xf32> to vector<8x64xf32>
    %110 = arith.addf %107, %109 : vector<8x64xf32>
    %cst_120 = arith.constant 0.000000e+00 : f32
    %111 = vector.broadcast %cst_120 : f32 to vector<8x64xf32>
    %112 = arith.cmpf ogt, %110, %111 : vector<8x64xf32>
    %cst_121 = arith.constant 0.000000e+00 : f32
    %113 = vector.broadcast %cst_121 : f32 to vector<8x64xf32>
    %114 = arith.minimumf %110, %113 : vector<8x64xf32>
    %115 = math.exp %114 : vector<8x64xf32>
    %cst_122 = arith.constant 1.000000e+00 : f32
    %116 = vector.broadcast %cst_122 : f32 to vector<8x64xf32>
    %117 = arith.subf %115, %116 : vector<8x64xf32>
    %118 = arith.select %112, %110, %117 : vector<8x64xi1>, vector<8x64xf32>
    %c0_123 = arith.constant 0 : index
    %c0_124 = arith.constant 0 : index
    %119 = vector.load %arg10[%c0_123, %c0_124] : memref<8x8xbf16, #tpu.memory_space<vmem>>, vector<8x8xbf16>
    %120 = arith.truncf %118 : vector<8x64xf32> to vector<8x64xbf16>
    %cst_125 = arith.constant dense<0.000000e+00> : vector<8x64xf32>
    %121 = tpu.matmul %119, %120, %cst_125 {dimension_numbers = #tpu.dot_dimension_numbers<[1], [0], [0], [1], [0, 0, 1, 1], [], []>} : vector<8x8xbf16>, vector<8x64xbf16>, vector<8x64xf32> -> vector<8x64xf32>
    %c0_126 = arith.constant 0 : index
    %c0_127 = arith.constant 0 : index
    %122 = vector.load %arg11[%c0_126, %c0_127] : memref<8x1xf32, #tpu.memory_space<vmem>>, vector<8x1xf32>
    %123 = vector.broadcast %122 : vector<8x1xf32> to vector<8x64xf32>
    %124 = arith.addf %121, %123 : vector<8x64xf32>
    %125 = arith.addf %87, %124 : vector<8x64xf32>
    %cst_128 = arith.constant 0.000000e+00 : f32
    %126 = vector.broadcast %cst_128 : f32 to vector<8x64xf32>
    %127 = arith.cmpf ogt, %125, %126 : vector<8x64xf32>
    %cst_129 = arith.constant 0.000000e+00 : f32
    %128 = vector.broadcast %cst_129 : f32 to vector<8x64xf32>
    %129 = arith.minimumf %125, %128 : vector<8x64xf32>
    %130 = math.exp %129 : vector<8x64xf32>
    %cst_130 = arith.constant 1.000000e+00 : f32
    %131 = vector.broadcast %cst_130 : f32 to vector<8x64xf32>
    %132 = arith.subf %130, %131 : vector<8x64xf32>
    %133 = arith.select %127, %125, %132 : vector<8x64xi1>, vector<8x64xf32>
    %134 = arith.truncf %133 : vector<8x64xf32> to vector<8x64xbf16>
    %135 = vector.extract_strided_slice %134 {offsets = [0, 0], sizes = [8, 32], strides = [1, 1]} : vector<8x64xbf16> to vector<8x32xbf16>
    %c0_131 = arith.constant 0 : index
    %c0_132 = arith.constant 0 : index
    %136 = vector.load %arg18[%c0_131, %c0_132] : memref<8x84xbf16, #tpu.memory_space<vmem>>, vector<8x32xbf16>
    tpu.vector_store %arg18[%c0_131, %c0_132], %135 {strides = array<i32>} : memref<8x84xbf16, #tpu.memory_space<vmem>>, vector<8x32xbf16>,
    %137 = vector.extract_strided_slice %134 {offsets = [0, 32], sizes = [8, 32], strides = [1, 1]} : vector<8x64xbf16> to vector<8x32xbf16>
    %c0_133 = arith.constant 0 : index
    %c42_134 = arith.constant 42 : index
    %138 = vector.load %arg18[%c0_133, %c42_134] : memref<8x84xbf16, #tpu.memory_space<vmem>>, vector<8x32xbf16>
    tpu.vector_store %arg18[%c0_133, %c42_134], %137 {strides = array<i32>} : memref<8x84xbf16, #tpu.memory_space<vmem>>, vector<8x32xbf16>,
    %c0_135 = arith.constant 0 : index
    %c0_136 = arith.constant 0 : index
    %139 = vector.load %arg18[%c0_135, %c0_136] : memref<8x84xbf16, #tpu.memory_space<vmem>>, vector<8x32xbf16>
    %c0_137 = arith.constant 0 : index
    %c0_138 = arith.constant 0 : index
    %140 = vector.load %arg17[%c0_137, %c0_138] : memref<24x64xbf16, #tpu.memory_space<vmem>>, vector<8x32xbf16>
    tpu.vector_store %arg17[%c0_137, %c0_138], %139 {strides = array<i32>} : memref<24x64xbf16, #tpu.memory_space<vmem>>, vector<8x32xbf16>,
    %c0_139 = arith.constant 0 : index
    %c5 = arith.constant 5 : index
    %141 = vector.load %arg18[%c0_139, %c5] : memref<8x84xbf16, #tpu.memory_space<vmem>>, vector<8x32xbf16>
    %c8_140 = arith.constant 8 : index
    %c0_141 = arith.constant 0 : index
    %142 = vector.load %arg17[%c8_140, %c0_141] : memref<24x64xbf16, #tpu.memory_space<vmem>>, vector<8x32xbf16>
    tpu.vector_store %arg17[%c8_140, %c0_141], %141 {strides = array<i32>} : memref<24x64xbf16, #tpu.memory_space<vmem>>, vector<8x32xbf16>,
    %c0_142 = arith.constant 0 : index
    %c10 = arith.constant 10 : index
    %143 = vector.load %arg18[%c0_142, %c10] : memref<8x84xbf16, #tpu.memory_space<vmem>>, vector<8x32xbf16>
    %c16_143 = arith.constant 16 : index
    %c0_144 = arith.constant 0 : index
    %144 = vector.load %arg17[%c16_143, %c0_144] : memref<24x64xbf16, #tpu.memory_space<vmem>>, vector<8x32xbf16>
    tpu.vector_store %arg17[%c16_143, %c0_144], %143 {strides = array<i32>} : memref<24x64xbf16, #tpu.memory_space<vmem>>, vector<8x32xbf16>,
    %c0_145 = arith.constant 0 : index
    %c42_146 = arith.constant 42 : index
    %145 = vector.load %arg18[%c0_145, %c42_146] : memref<8x84xbf16, #tpu.memory_space<vmem>>, vector<8x32xbf16>
    %c0_147 = arith.constant 0 : index
    %c32_148 = arith.constant 32 : index
    %146 = vector.load %arg17[%c0_147, %c32_148] : memref<24x64xbf16, #tpu.memory_space<vmem>>, vector<8x32xbf16>
    tpu.vector_store %arg17[%c0_147, %c32_148], %145 {strides = array<i32>} : memref<24x64xbf16, #tpu.memory_space<vmem>>, vector<8x32xbf16>,
    %c0_149 = arith.constant 0 : index
    %c47 = arith.constant 47 : index
    %147 = vector.load %arg18[%c0_149, %c47] : memref<8x84xbf16, #tpu.memory_space<vmem>>, vector<8x32xbf16>
    %c8_150 = arith.constant 8 : index
    %c32_151 = arith.constant 32 : index
    %148 = vector.load %arg17[%c8_150, %c32_151] : memref<24x64xbf16, #tpu.memory_space<vmem>>, vector<8x32xbf16>
    tpu.vector_store %arg17[%c8_150, %c32_151], %147 {strides = array<i32>} : memref<24x64xbf16, #tpu.memory_space<vmem>>, vector<8x32xbf16>,
    %c0_152 = arith.constant 0 : index
    %c52 = arith.constant 52 : index
    %149 = vector.load %arg18[%c0_152, %c52] : memref<8x84xbf16, #tpu.memory_space<vmem>>, vector<8x32xbf16>
    %c16_153 = arith.constant 16 : index
    %c32_154 = arith.constant 32 : index
    %150 = vector.load %arg17[%c16_153, %c32_154] : memref<24x64xbf16, #tpu.memory_space<vmem>>, vector<8x32xbf16>
    tpu.vector_store %arg17[%c16_153, %c32_154], %149 {strides = array<i32>} : memref<24x64xbf16, #tpu.memory_space<vmem>>, vector<8x32xbf16>,
    %c0_155 = arith.constant 0 : index
    %c0_156 = arith.constant 0 : index
    %151 = vector.load %arg12[%c0_155, %c0_156] : memref<8x24xbf16, #tpu.memory_space<vmem>>, vector<8x24xbf16>
    %c0_157 = arith.constant 0 : index
    %c0_158 = arith.constant 0 : index
    %152 = vector.load %arg17[%c0_157, %c0_158] : memref<24x64xbf16, #tpu.memory_space<vmem>>, vector<24x64xbf16>
    %cst_159 = arith.constant dense<0.000000e+00> : vector<8x64xf32>
    %153 = tpu.matmul %151, %152, %cst_159 {dimension_numbers = #tpu.dot_dimension_numbers<[1], [0], [0], [1], [0, 0, 1, 1], [], []>} : vector<8x24xbf16>, vector<24x64xbf16>, vector<8x64xf32> -> vector<8x64xf32>
    %c0_160 = arith.constant 0 : index
    %c0_161 = arith.constant 0 : index
    %154 = vector.load %arg13[%c0_160, %c0_161] : memref<8x1xf32, #tpu.memory_space<vmem>>, vector<8x1xf32>
    %155 = vector.broadcast %154 : vector<8x1xf32> to vector<8x64xf32>
    %156 = arith.addf %153, %155 : vector<8x64xf32>
    %cst_162 = arith.constant 0.000000e+00 : f32
    %157 = vector.broadcast %cst_162 : f32 to vector<8x64xf32>
    %158 = arith.cmpf ogt, %156, %157 : vector<8x64xf32>
    %cst_163 = arith.constant 0.000000e+00 : f32
    %159 = vector.broadcast %cst_163 : f32 to vector<8x64xf32>
    %160 = arith.minimumf %156, %159 : vector<8x64xf32>
    %161 = math.exp %160 : vector<8x64xf32>
    %cst_164 = arith.constant 1.000000e+00 : f32
    %162 = vector.broadcast %cst_164 : f32 to vector<8x64xf32>
    %163 = arith.subf %161, %162 : vector<8x64xf32>
    %164 = arith.select %158, %156, %163 : vector<8x64xi1>, vector<8x64xf32>
    %c0_165 = arith.constant 0 : index
    %c0_166 = arith.constant 0 : index
    %165 = vector.load %arg14[%c0_165, %c0_166] : memref<8x8xbf16, #tpu.memory_space<vmem>>, vector<8x8xbf16>
    %166 = arith.truncf %164 : vector<8x64xf32> to vector<8x64xbf16>
    %cst_167 = arith.constant dense<0.000000e+00> : vector<8x64xf32>
    %167 = tpu.matmul %165, %166, %cst_167 {dimension_numbers = #tpu.dot_dimension_numbers<[1], [0], [0], [1], [0, 0, 1, 1], [], []>} : vector<8x8xbf16>, vector<8x64xbf16>, vector<8x64xf32> -> vector<8x64xf32>
    %c0_168 = arith.constant 0 : index
    %c0_169 = arith.constant 0 : index
    %168 = vector.load %arg15[%c0_168, %c0_169] : memref<8x1xf32, #tpu.memory_space<vmem>>, vector<8x1xf32>
    %169 = vector.broadcast %168 : vector<8x1xf32> to vector<8x64xf32>
    %170 = arith.addf %167, %169 : vector<8x64xf32>
    %171 = arith.addf %133, %170 : vector<8x64xf32>
    %172 = vector.extract_strided_slice %171 {offsets = [0, 0], sizes = [8, 32], strides = [1, 1]} : vector<8x64xf32> to vector<8x32xf32>
    %c0_170 = arith.constant 0 : index
    %c0_171 = arith.constant 0 : index
    %c0_172 = arith.constant 0 : index
    %173 = vector.load %arg16[%c0_170, %c0_171, %c0_172] : memref<2x8x32xf32, #tpu.memory_space<vmem>>, vector<1x8x32xf32>
    %174 = vector.shape_cast %173 : vector<1x8x32xf32> to vector<8x32xf32>
    %175 = vector.shape_cast %172 : vector<8x32xf32> to vector<1x8x32xf32>
    tpu.vector_store %arg16[%c0_170, %c0_171, %c0_172], %175 {strides = array<i32>} : memref<2x8x32xf32, #tpu.memory_space<vmem>>, vector<1x8x32xf32>,
    %176 = vector.extract_strided_slice %171 {offsets = [0, 32], sizes = [8, 32], strides = [1, 1]} : vector<8x64xf32> to vector<8x32xf32>
    %c1_173 = arith.constant 1 : index
    %c0_174 = arith.constant 0 : index
    %c0_175 = arith.constant 0 : index
    %177 = vector.load %arg16[%c1_173, %c0_174, %c0_175] : memref<2x8x32xf32, #tpu.memory_space<vmem>>, vector<1x8x32xf32>
    %178 = vector.shape_cast %177 : vector<1x8x32xf32> to vector<8x32xf32>
    %179 = vector.shape_cast %176 : vector<8x32xf32> to vector<1x8x32xf32>
    tpu.vector_store %arg16[%c1_173, %c0_174, %c0_175], %179 {strides = array<i32>} : memref<2x8x32xf32, #tpu.memory_space<vmem>>, vector<1x8x32xf32>,
    return
  }
  func.func @transform_0(%arg0: i32) -> (i32, i32, i32) {
    %c0_i32 = arith.constant 0 : i32
    %c0_i32_0 = arith.constant 0 : i32
    %c0_i32_1 = arith.constant 0 : i32
    return %arg0, %c0_i32, %c0_i32_0 : i32, i32, i32
  }
  func.func @transform_1(%arg0: i32) -> (i32, i32) {
    %c0_i32 = arith.constant 0 : i32
    %c0_i32_0 = arith.constant 0 : i32
    %c0_i32_1 = arith.constant 0 : i32
    return %c0_i32, %c0_i32_0 : i32, i32
  }
  func.func @transform_2(%arg0: i32) -> (i32, i32) {
    %c0_i32 = arith.constant 0 : i32
    %c0_i32_0 = arith.constant 0 : i32
    %c0_i32_1 = arith.constant 0 : i32
    return %c0_i32, %c0_i32_0 : i32, i32
  }
  func.func @transform_3(%arg0: i32) -> (i32, i32) {
    %c0_i32 = arith.constant 0 : i32
    %c0_i32_0 = arith.constant 0 : i32
    %c0_i32_1 = arith.constant 0 : i32
    return %c0_i32, %c0_i32_0 : i32, i32
  }
  func.func @transform_4(%arg0: i32) -> (i32, i32) {
    %c0_i32 = arith.constant 0 : i32
    %c0_i32_0 = arith.constant 0 : i32
    %c0_i32_1 = arith.constant 0 : i32
    return %c0_i32, %c0_i32_0 : i32, i32
  }
  func.func @transform_5(%arg0: i32) -> (i32, i32) {
    %c0_i32 = arith.constant 0 : i32
    %c0_i32_0 = arith.constant 0 : i32
    %c0_i32_1 = arith.constant 0 : i32
    return %c0_i32, %c0_i32_0 : i32, i32
  }
  func.func @transform_6(%arg0: i32) -> (i32, i32) {
    %c0_i32 = arith.constant 0 : i32
    %c0_i32_0 = arith.constant 0 : i32
    %c0_i32_1 = arith.constant 0 : i32
    return %c0_i32, %c0_i32_0 : i32, i32
  }
  func.func @transform_7(%arg0: i32) -> (i32, i32) {
    %c0_i32 = arith.constant 0 : i32
    %c0_i32_0 = arith.constant 0 : i32
    %c0_i32_1 = arith.constant 0 : i32
    return %c0_i32, %c0_i32_0 : i32, i32
  }
  func.func @transform_8(%arg0: i32) -> (i32, i32) {
    %c0_i32 = arith.constant 0 : i32
    %c0_i32_0 = arith.constant 0 : i32
    %c0_i32_1 = arith.constant 0 : i32
    return %c0_i32, %c0_i32_0 : i32, i32
  }
  func.func @transform_9(%arg0: i32) -> (i32, i32) {
    %c0_i32 = arith.constant 0 : i32
    %c0_i32_0 = arith.constant 0 : i32
    %c0_i32_1 = arith.constant 0 : i32
    return %c0_i32, %c0_i32_0 : i32, i32
  }
  func.func @transform_10(%arg0: i32) -> (i32, i32) {
    %c0_i32 = arith.constant 0 : i32
    %c0_i32_0 = arith.constant 0 : i32
    %c0_i32_1 = arith.constant 0 : i32
    return %c0_i32, %c0_i32_0 : i32, i32
  }
  func.func @transform_11(%arg0: i32) -> (i32, i32) {
    %c0_i32 = arith.constant 0 : i32
    %c0_i32_0 = arith.constant 0 : i32
    %c0_i32_1 = arith.constant 0 : i32
    return %c0_i32, %c0_i32_0 : i32, i32
  }
  func.func @transform_12(%arg0: i32) -> (i32, i32) {
    %c0_i32 = arith.constant 0 : i32
    %c0_i32_0 = arith.constant 0 : i32
    %c0_i32_1 = arith.constant 0 : i32
    return %c0_i32, %c0_i32_0 : i32, i32
  }
  func.func @transform_13(%arg0: i32) -> (i32, i32) {
    %c0_i32 = arith.constant 0 : i32
    %c0_i32_0 = arith.constant 0 : i32
    %c0_i32_1 = arith.constant 0 : i32
    return %c0_i32, %c0_i32_0 : i32, i32
  }
  func.func @transform_14(%arg0: i32) -> (i32, i32) {
    %c0_i32 = arith.constant 0 : i32
    %c0_i32_0 = arith.constant 0 : i32
    %c0_i32_1 = arith.constant 0 : i32
    return %c0_i32, %c0_i32_0 : i32, i32
  }
  func.func @transform_15(%arg0: i32) -> (i32, i32, i32) {
    %c0_i32 = arith.constant 0 : i32
    %c0_i32_0 = arith.constant 0 : i32
    %c0_i32_1 = arith.constant 0 : i32
    return %arg0, %c0_i32, %c0_i32_0 : i32, i32, i32
  }
}

</mosaic_0001>

<bundles_post_ra>
// kernel: decoder_block.1
= control target key start
LH: loop header
LB: loop body
LE: loop exit
PB: predicated region body
PF: predicated region fallthrough
CT: control target
= control target key end

     0   :  { %s1884_s0 = inlined_call_operand.vmem [shape: bf16[4,4,35], index: 0, kind: input, shape index: {}]   ;;  %s1885_s1 = inlined_call_operand.vmem [shape: bf16[8,16], index: 1, kind: input, shape index: {}]   ;;  %s1886_s2 = inlined_call_operand.vmem [shape: f32[8,1], index: 2, kind: input, shape index: {}]   ;;  %s1887_s3 = inlined_call_operand.vmem [shape: bf16[8,24], index: 3, kind: input, shape index: {}]   ;;  %s1888_s4 = inlined_call_operand.vmem [shape: f32[8,1], index: 4, kind: input, shape index: {}]   ;;  %s1889_s5 = inlined_call_operand.vmem [shape: bf16[8,8], index: 5, kind: input, shape index: {}]   ;;  %s1890_s6 = inlined_call_operand.vmem [shape: f32[8,1], index: 6, kind: input, shape index: {}]   ;;  %s1891_s7 = inlined_call_operand.vmem [shape: bf16[8,24], index: 7, kind: input, shape index: {}]   ;;  %s1892_s8 = inlined_call_operand.vmem [shape: f32[8,1], index: 8, kind: input, shape index: {}]   ;;  %s1893_s9 = inlined_call_operand.vmem [shape: bf16[8,8], index: 9, kind: input, shape index: {}]   ;;  %s1894_s10 = inlined_call_operand.vmem [shape: f32[8,1], index: 10, kind: input, shape index: {}]   ;;  %s1895_s11 = inlined_call_operand.vmem [shape: bf16[8,24], index: 11, kind: input, shape index: {}]   ;;  %s1896_s12 = inlined_call_operand.vmem [shape: f32[8,1], index: 12, kind: input, shape index: {}]   ;;  %s1897_s13 = inlined_call_operand.vmem [shape: bf16[8,8], index: 13, kind: input, shape index: {}]   ;;  %s1898_s14 = inlined_call_operand.vmem [shape: f32[8,1], index: 14, kind: input, shape index: {}]   ;;  %s1899_s15 = inlined_call_operand.hbm [shape: f32[4,8,32], index: 15, kind: output, shape index: {}]  }
   0x1   :  { %1905 = sst [smem:[#allocation8_spill]] %s1884_s0 }
   0x2   :  { %1906 = sst [smem:[#allocation9_spill]] %s1885_s1 }
   0x3   :  { %1907 = sst [smem:[#allocation10_spill]] %s1886_s2 }
   0x4   :  { %1908 = sst [smem:[#allocation11_spill]] %s1887_s3 }
   0x5   :  { %20 = vsyncpa [#allocation5], 0 }
   0x6   :  { %22 = vsyncpa [#allocation5 + $0x1], 0  ;;  %s1650_s18 = smov 0   ;;  %s1652_s19 = smov 0  }
   0x7   :  { %s1654_s20 = smov 0   ;;  %s1656_s21 = smov 0  }
   0x8 LB: > { %s1671_s22 = sadd.s32 4294967295, %s1543_s21   ;;  %s1280_s23 = sadd.s32 4294967294, %s1543_s21   ;;  %s1543_s21 = sphi %s1656_s21, %s1923_s21   ;;  %s1539_s20 = sphi %s1654_s20, %s1922_s20   ;;  %s1535_s19 = sphi %s1652_s19, %s1921_s19   ;;  %s1531_s18 = sphi %s1650_s18, %s1920_s18  }
   0x9   : > { %s1675_s24 = sadd.s32 1, %s1543_s21   ;;  %s355_s25 = sadd.s32 1, %s1539_s20 }
   0xa   : > { %s352_s26 = ssub.s32 %s1543_s21, %s1675_s24  ;;  %p365_p0 = scmp.ne.s32.totalorder %s1539_s20, %s1535_s19 }
   0xb   : > { %p353_p1 = scmp.eq.s32.totalorder %s352_s26, 0  ;;  %p366_p2 = scmp.eq.s32.totalorder %s1671_s22, 1 }
   0xc   : > { %p371_p3 = scmp.ne.s32.totalorder %s1535_s19, %s1531_s18  ;;  %p372_p4 = scmp.eq.s32.totalorder %s1280_s23, 1 }
   0xd   : > { %s1686_s27 = scalar_select %p353_p1, %s1539_s20, %s355_s25  }
   0xe   : > { %p1688_p5 = por %p366_p2, %p365_p0  ;;  %p1692_p6 = por %p372_p4, %p371_p3 }
   0xf   : > { %1909 = sst [smem:[#allocation7_spill]] %s1686_s27  ;;  %p1283_p7 = scmp.ge.s32.totalorder %s1543_s21, 1 }
  0x10   : > { %p441_p8 = scmp.lt.s32.totalorder %s1543_s21, 3 }
  0x12   : > { %p442_p9 = pnand %p1283_p7, %p441_p8 }
  0x13   : > { %s1285_s30 = sshll.u32 (!%p442_p9), %s1671_s22, 1  ;;  %v517_v0 = vlaneseq (!%p442_p9)  ;;  %v1545_v1 = vmov (!%p442_p9), 1983009808   ;;  %s1912_s0 = sld [smem:[#allocation8_spill]] (!%p442_p9)  ;;  %v1548_v9 = vmov (!%p442_p9), 0.0   ;;  %vm524_vm0 = vcmask (!%p442_p9), 257026  }
  0x14   : > { %445 = sbr.rel (%p442_p9) target bundleno = 2712 (0xa98), region = 80  ;;  %p490_p10 = scmp.lt.s32.totalorder (!%p442_p9), %s1285_s30, 3  ;;  %v515_v2 = vunpack.c.l.s4 (!%p442_p9), %v1545_v1  ;;  %1345 = vmatprep.subr.bf16.mxu0 (!%p442_p9), %v1548_v9  ;;  %1351 = vmatprep.subr.bf16.mxu1 (!%p442_p9), %v1548_v9  ;;  %vm1553_vm1 = vmmov (!%p442_p9), 0   ;;  %vm667_vm2 = vcmask (!%p442_p9), 339200   ;;  %v1555_v18 = vmov (!%p442_p9), 0   ;;  %v796_v47 = vld [vmem:[%s1890_s6] sm:$0xff] (!%p442_p9) }
  0x15   : > { %v518_v3 = vshrl.u32 (!%p442_p9), %v517_v0, 7  ;;  %s1900_s26 = smov (!%p442_p9), 125   ;;  %s1547_s27 = smov (!%p442_p9), 127   ;;  %1347 = vmatprep.mubr.msk.bf16.mxu0 (!%p442_p9), %vm1553_vm1, %v1548_v9  ;;  %1355 = vmatprep.mubr.msk.bf16.mxu1 (!%p442_p9), %vm1553_vm1, %v1548_v9  ;;  %668 = vst.msk [vmem:[#allocation3] sm:$0xf] (!%p442_p9), %vm667_vm2, %v1555_v18  ;;  %vm509_vm3 = vcmask (!%p442_p9), 254976  }
  0x16   : > { %v516_v4 = vunpack.c.0.s8 (!%p442_p9), %v515_v2  ;;  %s1551_s17 = smov (!%p442_p9), 30   ;;  %s1552_s23 = smov (!%p442_p9), 31   ;;  %1456 = vset.pattern.permute.xlu1 (!%p442_p9), %v1555_v18  ;;  %1457 = vset.pattern.permute.xlu0 (!%p442_p9), %v1555_v18  ;;  %vm564_vm4 = vcmask (!%p442_p9), 517376   ;;  %vm579_vm5 = vcmask (!%p442_p9), 519426   ;;  %vm623_vm6 = vcmask (!%p442_p9), 130048   ;;  %v725_v48 = vld [vmem:[%s1888_s4] sm:$0xff] (!%p442_p9) }
  0x17   : > { %s1913_s2 = sld [smem:[#allocation10_spill]] (!%p442_p9)  ;;  %s1914_s1 = sld [smem:[#allocation9_spill]] (!%p442_p9)  ;;  %vm669_vm7 = vcmask (!%p442_p9), 683600   ;;  %vm678_vm9 = vcmask (!%p442_p9), 257024   ;;  %vm686_vm10 = vcmask (!%p442_p9), 601424   ;;  %vm707_vm11 = vcmask (!%p442_p9), 519424  }
  0x18   : > { %v519_v5 = vsub.s32 (!%p442_p9), %v516_v4, %v518_v3  ;;  %670 = vst.msk [vmem:[#allocation3] sm:$0xf] (!%p442_p9), %vm669_vm7, %v1555_v18  ;;  %vm744_vm12 = vcmask (!%p442_p9), 1043456   ;;  %s1915_s3 = sld [smem:[#allocation11_spill]] (!%p442_p9)  ;;  %vm740_vm13 = vcmask (!%p442_p9), 195584   ;;  %vm802_vm15 = vcmask (!%p442_p9), 64512  }
  0x1b   : > { %s1925_s30 = smov (!%p490_p10, %s1285_s30), 3 }
  0x1c   : > { %s1286_s16 = sshll.u32 %s1925_s30, 1  ;;  %s1549_s30 = smov 126  }
  0x1d   : > { %s493_s25 = scalar_lea.vmem %s1912_s0, %s1286_s16  ;;  %s1550_s16 = smov 29   ;;  %v611_v17 = vld [vmem:[%s1913_s2] sm:$0xff] }
  0x1e   : > { %v1287_v6 = vld.sshfl [vmem:[%s493_s25] sm:$0x3 pattern:$0x76325410]  ;;  %s1561_s0 = smov 115   ;;  %s1327_s2 = sshll.u32 %s1671_s22, 8 }
  0x1f   : > { %506 = vrot.lane.b32.xlu0 %v1287_v6, %s1900_s26  ;;  %535 = vrot.lane.b32.xlu1 %v1287_v6, %s1547_s27  ;;  %v1458_v7 = vld [vmem:[%s493_s25] ss:$0 sps:$4 sm:$0x33]   ;;  %v1459_v11 = vld [vmem:[%s493_s25 + $0x2] ss:$0 sps:$4 sm:$0x33]  }
  0x20   : > { %v1290_v8 = vld.sshfl [vmem:[%s493_s25 + $0x2] sm:$0x3 pattern:$0x76325410]  ;;  %v520_v10 = vrot.slane %v1458_v7, %v519_v5  ;;  %v575_v13 = vrot.slane %v1459_v11, %v519_v5  ;;  %s1559_s26 = smov 116   ;;  %s1567_s22 = smov [#allocation4]  }
  0x21   : > { %v1461_v12 = vld [vmem:[%s493_s25] ss:$0 sps:$4 sm:$0x33]   ;;  %v1460_v14 = vld [vmem:[%s493_s25 + $0x2] ss:$0 sps:$4 sm:$0x33]  }
  0x22   : > { %v548_v15 = vrot.slane %v1461_v12, %v519_v5  ;;  %v603_v16 = vrot.slane %v1460_v14, %v519_v5  ;;  %s1554_s25 = smov 32   ;;  %v608_v27 = vld [vmem:[%s1914_s1] sm:$0xf] }
  0x23   : > { %521 = vrot.lane.b32.xlu0 %v520_v10, %s1549_s30  ;;  %561 = vrot.lane.b32.xlu1 %v1290_v8, %s1550_s16  ;;  %s1903_s16 = smov 118   ;;  %v721_v57 = vld [vmem:[%s1915_s3] sm:$0xf] }
  0x24   : > { %550 = vst.msk [vmem:[#allocation2 + $0x4] sm:$0xc] %vm524_vm0, %v548_v15  ;;  %v794_v7 = vld [vmem:[%s1889_s5] sm:$0xf] }
  0x27   : > { %576 = vrot.lane.b32.xlu0 %v575_v13, %s1551_s17  ;;  %590 = vrot.lane.b32.xlu1 %v1290_v8, %s1552_s23  ;;  %s1901_s23 = smov 10   ;;  %s1560_s17 = smov 122  }
  0x2b   : > { %604 = vrot.lane.b32.xlu0 %v603_v16, %s1554_s25  ;;  %614 = vperm.xlu1 %1456, %v611_v17   ;;  %s1558_s25 = smov 117  }
  0x91   : > { %v507_v19 = vpop.permute.xlu0 %506  ;;  %v536_v20 = vpop.permute.xlu1 %535 }
  0x92   : > { %510 = vst.msk [vmem:[#allocation2] sm:$0x3] %vm509_vm3, %v507_v19  ;;  %538 = vst.msk [vmem:[#allocation2 + $0x4] sm:$0x3] %vm509_vm3, %v536_v20 }
  0x95   : > { %v522_v21 = vpop.permute.xlu0 %521  ;;  %v562_v22 = vpop.permute.xlu1 %561 }
  0x96   : > { %525 = vst.msk [vmem:[#allocation2] sm:$0xc] %vm524_vm0, %v522_v21 }
  0x97   : > { %565 = vst.msk [vmem:[#allocation2] sm:$0x3] %vm564_vm4, %v562_v22 }
  0x99   : > { %v577_v23 = vpop.permute.xlu0 %576  ;;  %v591_v24 = vpop.permute.xlu1 %590 }
  0x9a   : > { %580 = vst.msk [vmem:[#allocation2] sm:$0xc] %vm579_vm5, %v577_v23 }
  0x9b   : > { %593 = vst.msk [vmem:[#allocation2 + $0x4] sm:$0x3] %vm564_vm4, %v591_v24  ;;  %vm1196_vm4 = vcmask 261120  }
  0x9d   : > { %v605_v25 = vpop.permute.xlu0 %604 }
  0x9e   : > { %607 = vst.msk [vmem:[#allocation2 + $0x4] sm:$0xc] %vm579_vm5, %v605_v25 }
  0xa5   : > { %v1462_v26 = vld [vmem:[#allocation2] sm:$0xff]  }
  0xa6   : > { %1346 = vmatpush3.bf16.msra.mxu0 %v1462_v26 }
  0xa7   : > { %1359 = vmatprep.subr.bf16.mxu0 %v1548_v9 }
  0xa9   : > { %1348 = vmatmul.mubr.msk.bf16.vlgmr.msra.gmra.mrb[0].mxu0 %vm623_vm6, %v608_v27 }
  0xaa   : > { %1361 = vmatprep.mubr.msk.bf16.mxu0 %vm1553_vm1, %v1548_v9  ;;  %v615_v28 = vpop.permute.xlu1 %614 }
 0x17c   : > { %v661_v29 = vpop.f32.mrb[0].mxu0 }
 0x17d   : > { %v662_v30 = vadd.f32 %v661_v29, %v615_v28  ;;  %v1349_v31 = vpop.f32.mrb[1].mxu0  ;;  %v901_v28 = vld [vmem:[%s1892_s8] sm:$0xff] }
 0x17e   : > { %v664_v32 = vpop.f32.mrb[2].mxu0 }
 0x17f   : > { %v672_v33 = vmin.f32 %v662_v30, 0.0  ;;  %v1350_v34 = vpop.f32.mrb[3].mxu0  ;;  %vm671_vm8 = vcmp.gt.f32.partialorder %v662_v30, 0.0 }
 0x181   : > { %v673_v35 = vmul.f32 1.442695, %v672_v33 }
 0x183   : > { %1469 = vpow2.f32 %v673_v35 }
 0x18d   : > { %v1470_v36 = vpop.eup %1469 }
 0x18e   : > { %v1297_v37 = vadd.f32 -1.0, %v1470_v36 }
 0x190   : > { %v1722_v38 = vsel %vm671_vm8, %v662_v30, %v1297_v37  ;;  %v970_v30 = vld [vmem:[%s1894_s10] sm:$0xff] }
 0x191   : > { %v677_v39 = vpack.c.bf16 %v1722_v38, %v1722_v38 }
 0x193   : > { %683 = vrot.lane.b32.xlu0 %v677_v39, %s1901_s23  ;;  %679 = vst.msk [vmem:[#allocation3] sm:$0xf] %vm678_vm9, %v677_v39  ;;  %s1562_s23 = smov 112   ;;  %v897_v39 = vld [vmem:[%s1891_s7] sm:$0xf] }
 0x205   : > { %v684_v40 = vpop.permute.xlu0 %683 }
 0x206   : > { %687 = vst.msk [vmem:[#allocation3] sm:$0xf] %vm686_vm10, %v684_v40 }
 0x20d   : > { %v702_v41 = vld [vmem:[#allocation3] sm:$0xf] }
 0x20e   : > { %v690_v42 = vld [vmem:[#allocation3] sm:$0xf]  ;;  %704 = vrot.lane.b32.xlu0 %v702_v41, %s1903_s16  ;;  %s1916_s16 = smov 10  }
 0x20f   : > { %692 = vrot.lane.b32.xlu1 %v690_v42, %s1547_s27  ;;  %v688_v43 = vld [vmem:[#allocation3] sm:$0xf]  ;;  %s1564_s27 = smov 113  }
 0x210   : > { %689 = vst.msk [vmem:[#allocation2] sm:$0xf] %vm678_vm9, %v688_v43  ;;  %v696_v44 = vld [vmem:[#allocation3] sm:$0xf] }
 0x211   : > { %v709_v45 = vld [vmem:[#allocation3] sm:$0xf] }
 0x212   : > { %698 = vrot.lane.b32.xlu0 %v696_v44, %s1549_s30  ;;  %v715_v46 = vld [vmem:[#allocation3] sm:$0xf]  ;;  %s1566_s30 = smov 96  }
 0x213   : > { %711 = vrot.lane.b32.xlu1 %v709_v45, %s1558_s25  ;;  %s1917_s25 = smov 118  }
 0x216   : > { %728 = vperm.xlu0 %1457, %v725_v48  }
 0x217   : > { %717 = vrot.lane.b32.xlu1 %v715_v46, %s1559_s26  ;;  %s1918_s26 = smov 125  }
 0x21b   : > { %799 = vperm.xlu1 %1456, %v796_v47  }
 0x280   : > { %v705_v49 = vpop.permute.xlu0 %704 }
 0x281   : > { %v693_v50 = vpop.permute.xlu1 %692  ;;  %708 = vst.msk [vmem:[#allocation2] sm:$0xf] %vm707_vm11, %v705_v49 }
 0x282   : > { %695 = vst.msk [vmem:[#allocation2 + $0x4] sm:$0xf] %vm678_vm9, %v693_v50 }
 0x284   : > { %v699_v51 = vpop.permute.xlu0 %698 }
 0x285   : > { %v712_v52 = vpop.permute.xlu1 %711  ;;  %701 = vst.msk [vmem:[#allocation2 + $0x8] sm:$0xf] %vm678_vm9, %v699_v51 }
 0x286   : > { %714 = vst.msk [vmem:[#allocation2 + $0x4] sm:$0xf] %vm707_vm11, %v712_v52 }
 0x289   : > { %v718_v53 = vpop.permute.xlu1 %717 }
 0x28a   : > { %720 = vst.msk [vmem:[#allocation2 + $0x8] sm:$0xf] %vm707_vm11, %v718_v53  ;;  %v968_v53 = vld [vmem:[%s1893_s9] sm:$0xf] }
 0x28d   : > { %v1463_v54 = vld [vmem:[#allocation2] sm:$0xff]  }
 0x28e   : > { %1352 = vmatpush3.bf16.msra.mxu1 %v1463_v54 }
 0x28f   : > { %1353 = vmatprep.subr.bf16.mxu1 %v1548_v9 }
 0x291   : > { %v1464_v55 = vld [vmem:[#allocation2 + $0x8] ss:$0 sps:$4 sm:$0xff]  }
 0x292   : > { %v746_v56 = vsel %vm744_vm12, %v1464_v55, 0 }
 0x293   : > { %1354 = vmatpush3.bf16.msra.mxu1 %v746_v56 }
 0x294   : > { %1365 = vmatprep.subr.bf16.mxu1 %v1548_v9 }
 0x295   : > { %v729_v58 = vpop.permute.xlu0 %728 }
 0x296   : > { %1356 = vmatmul.mubr.msk.bf16.vlgmr.msra.gmra.mrb[0].mxu1 %vm740_vm13, %v721_v57 }
 0x297   : > { %1369 = vmatprep.mubr.msk.bf16.mxu1 %vm1553_vm1, %v1548_v9 }
 0x29a   : > { %v800_v8 = vpop.permute.xlu1 %799 }
 0x369   : > { %v782_v59 = vpop.f32.mrb[0].mxu1 }
 0x36a   : > { %v783_v60 = vadd.f32 %v782_v59, %v729_v58  ;;  %v1357_v61 = vpop.f32.mrb[1].mxu1 }
 0x36b   : > { %v785_v62 = vpop.f32.mrb[2].mxu1 }
 0x36c   : > { %v789_v63 = vmin.f32 %v783_v60, 0.0  ;;  %v1358_v0 = vpop.f32.mrb[3].mxu1  ;;  %vm788_vm14 = vcmp.gt.f32.partialorder %v783_v60, 0.0 }
 0x36e   : > { %v790_v1 = vmul.f32 1.442695, %v789_v63 }
 0x370   : > { %1471 = vpow2.f32 %v790_v1 }
 0x37a   : > { %v1472_v2 = vpop.eup %1471 }
 0x37b   : > { %v1302_v3 = vadd.f32 -1.0, %v1472_v2 }
 0x37d   : > { %v793_v4 = vsel %vm788_vm14, %v783_v60, %v1302_v3 }
 0x37e   : > { %v795_v5 = vpack.c.bf16 %v793_v4, %v793_v4 }
 0x380   : > { %v807_v6 = vsel %vm744_vm12, %v795_v5, 0 }
 0x381   : > { %1360 = vmatpush3.bf16.msra.mxu0 %v807_v6 }
 0x382   : > { %1373 = vmatprep.subr.bf16.mxu0 %v1548_v9 }
 0x384   : > { %1362 = vmatmul.mubr.msk.bf16.vlgmr.msra.gmra.mrb[4].mxu0 %vm802_vm15, %v794_v7 }
 0x385   : > { %1375 = vmatprep.mubr.msk.bf16.mxu0 %vm1553_vm1, %v1548_v9 }
 0x457   : > { %v843_v10 = vpop.f32.mrb[4].mxu0 }
 0x458   : > { %v844_v11 = vadd.f32 %v843_v10, %v800_v8  ;;  %v1363_v12 = vpop.f32.mrb[5].mxu0  ;;  %v1074_v10 = vld [vmem:[%s1896_s12] sm:$0xff] }
 0x459   : > { %v846_v13 = vpop.f32.mrb[6].mxu0  ;;  %v1143_v12 = vld [vmem:[%s1898_s14] sm:$0xff] }
 0x45a   : > { %v849_v14 = vadd.f32 %v844_v11, %v1722_v38  ;;  %v1364_v15 = vpop.f32.mrb[7].mxu0 }
 0x45c   : > { %v851_v16 = vmin.f32 %v849_v14, 0.0  ;;  %vm850_vm0 = vcmp.gt.f32.partialorder %v849_v14, 0.0 }
 0x45e   : > { %v852_v17 = vmul.f32 1.442695, %v851_v16 }
 0x460   : > { %1473 = vpow2.f32 %v852_v17 }
 0x46a   : > { %v1474_v18 = vpop.eup %1473 }
 0x46b   : > { %v1304_v19 = vadd.f32 -1.0, %v1474_v18 }
 0x46d   : > { %v1762_v20 = vsel %vm850_vm0, %v849_v14, %v1304_v19 }
 0x46e   : > { %v856_v21 = vpack.c.bf16 %v1762_v20, %v1762_v20 }
 0x470   : > { %861 = vrot.lane.b32.xlu1 %v856_v21, %s1916_s16  ;;  %857 = vst.msk [vmem:[#allocation3] sm:$0xf] %vm678_vm9, %v856_v21  ;;  %v1070_v21 = vld [vmem:[%s1895_s11] sm:$0xf] }
 0x4e2   : > { %v862_v22 = vpop.permute.xlu1 %861 }
 0x4e3   : > { %864 = vst.msk [vmem:[#allocation3] sm:$0xf] %vm686_vm10, %v862_v22 }
 0x4ea   : > { %v879_v23 = vld [vmem:[#allocation3] sm:$0xf] }
 0x4eb   : > { %v867_v24 = vld [vmem:[#allocation3] sm:$0xf]  ;;  %881 = vrot.lane.b32.xlu1 %v879_v23, %s1917_s25 }
 0x4ec   : > { %869 = vrot.lane.b32.xlu0 %v867_v24, %s1918_s26  ;;  %v865_v25 = vld [vmem:[#allocation3] sm:$0xf] }
 0x4ed   : > { %866 = vst.msk [vmem:[#allocation2] sm:$0xf] %vm678_vm9, %v865_v25  ;;  %v873_v26 = vld [vmem:[#allocation3] sm:$0xf] }
 0x4ee   : > { %v885_v27 = vld [vmem:[#allocation3] sm:$0xf] }
 0x4ef   : > { %875 = vrot.lane.b32.xlu1 %v873_v26, %s1560_s17  ;;  %v891_v29 = vld [vmem:[#allocation3] sm:$0xf]  ;;  %s1841_s17 = scalar_lea.hbm %s1899_s15, %s1327_s2 }
 0x4f0   : > { %887 = vrot.lane.b32.xlu0 %v885_v27, %s1561_s0  ;;  %s1563_s0 = smov 123  }
 0x4f3   : > { %904 = vperm.xlu1 %1456, %v901_v28  }
 0x4f4   : > { %893 = vrot.lane.b32.xlu0 %v891_v29, %s1562_s23  ;;  %s1565_s23 = smov 108  }
 0x4f8   : > { %973 = vperm.xlu0 %1457, %v970_v30  }
 0x55d   : > { %v882_v31 = vpop.permute.xlu1 %881 }
 0x55e   : > { %v870_v32 = vpop.permute.xlu0 %869  ;;  %884 = vst.msk [vmem:[#allocation2] sm:$0xf] %vm707_vm11, %v882_v31 }
 0x55f   : > { %872 = vst.msk [vmem:[#allocation2 + $0x4] sm:$0xf] %vm678_vm9, %v870_v32 }
 0x561   : > { %v876_v33 = vpop.permute.xlu1 %875 }
 0x562   : > { %v888_v34 = vpop.permute.xlu0 %887  ;;  %878 = vst.msk [vmem:[#allocation2 + $0x8] sm:$0xf] %vm678_vm9, %v876_v33 }
 0x563   : > { %890 = vst.msk [vmem:[#allocation2 + $0x4] sm:$0xf] %vm707_vm11, %v888_v34  ;;  %v1141_v34 = vld [vmem:[%s1897_s13] sm:$0xf] }
 0x566   : > { %v894_v35 = vpop.permute.xlu0 %893 }
 0x567   : > { %896 = vst.msk [vmem:[#allocation2 + $0x8] sm:$0xf] %vm707_vm11, %v894_v35 }
 0x56a   : > { %v1465_v36 = vld [vmem:[#allocation2] sm:$0xff]  }
 0x56b   : > { %1366 = vmatpush3.bf16.msra.mxu1 %v1465_v36 }
 0x56c   : > { %1367 = vmatprep.subr.bf16.mxu1 %v1548_v9 }
 0x56e   : > { %v1466_v37 = vld [vmem:[#allocation2 + $0x8] ss:$0 sps:$4 sm:$0xff]  }
 0x56f   : > { %v920_v38 = vsel %vm744_vm12, %v1466_v37, 0 }
 0x570   : > { %1368 = vmatpush3.bf16.msra.mxu1 %v920_v38 }
 0x571   : > { %1379 = vmatprep.subr.bf16.mxu1 %v1548_v9 }
 0x572   : > { %v905_v40 = vpop.permute.xlu1 %904 }
 0x573   : > { %1370 = vmatmul.mubr.msk.bf16.vlgmr.msra.gmra.mrb[4].mxu1 %vm740_vm13, %v897_v39 }
 0x574   : > { %1383 = vmatprep.mubr.msk.bf16.mxu1 %vm1553_vm1, %v1548_v9 }
 0x577   : > { %v974_v54 = vpop.permute.xlu0 %973 }
 0x646   : > { %v956_v41 = vpop.f32.mrb[4].mxu1 }
 0x647   : > { %v957_v42 = vadd.f32 %v956_v41, %v905_v40  ;;  %v1371_v43 = vpop.f32.mrb[5].mxu1 }
 0x648   : > { %v959_v44 = vpop.f32.mrb[6].mxu1 }
 0x649   : > { %v963_v45 = vmin.f32 %v957_v42, 0.0  ;;  %v1372_v46 = vpop.f32.mrb[7].mxu1  ;;  %vm962_vm2 = vcmp.gt.f32.partialorder %v957_v42, 0.0 }
 0x64b   : > { %v964_v47 = vmul.f32 1.442695, %v963_v45 }
 0x64d   : > { %1475 = vpow2.f32 %v964_v47 }
 0x657   : > { %v1476_v48 = vpop.eup %1475 }
 0x658   : > { %v1309_v49 = vadd.f32 -1.0, %v1476_v48 }
 0x65a   : > { %v967_v50 = vsel %vm962_vm2, %v957_v42, %v1309_v49 }
 0x65b   : > { %v969_v51 = vpack.c.bf16 %v967_v50, %v967_v50 }
 0x65d   : > { %v980_v52 = vsel %vm744_vm12, %v969_v51, 0 }
 0x65e   : > { %1374 = vmatpush3.bf16.msra.mxu0 %v980_v52 }
 0x65f   : > { %1387 = vmatprep.subr.bf16.mxu0 %v1548_v9 }
 0x661   : > { %1376 = vmatmul.mubr.msk.bf16.vlgmr.msra.gmra.mrb[8].mxu0 %vm802_vm15, %v968_v53 }
 0x662   : > { %1389 = vmatprep.mubr.msk.bf16.mxu0 %vm1553_vm1, %v1548_v9 }
 0x734   : > { %v1016_v55 = vpop.f32.mrb[8].mxu0 }
 0x735   : > { %v1017_v56 = vadd.f32 %v1016_v55, %v974_v54  ;;  %v1377_v57 = vpop.f32.mrb[9].mxu0 }
 0x736   : > { %v1019_v58 = vpop.f32.mrb[10].mxu0 }
 0x737   : > { %v1022_v59 = vadd.f32 %v1017_v56, %v1762_v20  ;;  %v1378_v60 = vpop.f32.mrb[11].mxu0 }
 0x739   : > { %v1024_v61 = vmin.f32 %v1022_v59, 0.0  ;;  %vm1023_vm3 = vcmp.gt.f32.partialorder %v1022_v59, 0.0 }
 0x73b   : > { %v1025_v62 = vmul.f32 1.442695, %v1024_v61 }
 0x73d   : > { %1477 = vpow2.f32 %v1025_v62 }
 0x747   : > { %v1478_v63 = vpop.eup %1477 }
 0x748   : > { %v1311_v0 = vadd.f32 -1.0, %v1478_v63 }
 0x74a   : > { %v1801_v1 = vsel %vm1023_vm3, %v1022_v59, %v1311_v0 }
 0x74b   : > { %v1029_v2 = vpack.c.bf16 %v1801_v1, %v1801_v1 }
 0x74d   : > { %1034 = vrot.lane.b32.xlu1 %v1029_v2, %s1916_s16  ;;  %1030 = vst.msk [vmem:[#allocation3] sm:$0xf] %vm678_vm9, %v1029_v2 }
 0x7bf   : > { %v1035_v3 = vpop.permute.xlu1 %1034 }
 0x7c0   : > { %1037 = vst.msk [vmem:[#allocation3] sm:$0xf] %vm686_vm10, %v1035_v3 }
 0x7c7   : > { %v1052_v4 = vld [vmem:[#allocation3] sm:$0xf] }
 0x7c8   : > { %v1040_v5 = vld [vmem:[#allocation3] sm:$0xf]  ;;  %1054 = vrot.lane.b32.xlu1 %v1052_v4, %s1917_s25 }
 0x7c9   : > { %1042 = vrot.lane.b32.xlu0 %v1040_v5, %s1563_s0  ;;  %v1038_v6 = vld [vmem:[#allocation3] sm:$0xf] }
 0x7ca   : > { %1039 = vst.msk [vmem:[#allocation2] sm:$0xf] %vm678_vm9, %v1038_v6  ;;  %v1046_v7 = vld [vmem:[#allocation3] sm:$0xf] }
 0x7cb   : > { %v1058_v8 = vld [vmem:[#allocation3] sm:$0xf] }
 0x7cc   : > { %1048 = vrot.lane.b32.xlu1 %v1046_v7, %s1917_s25  ;;  %v1064_v11 = vld [vmem:[#allocation3] sm:$0xf] }
 0x7cd   : > { %1060 = vrot.lane.b32.xlu0 %v1058_v8, %s1564_s27  ;;  %s486_s27 = sand.u32 1, %s1535_s19  }
 0x7ce   : > { %s1284_s16 = sshll.u32 %s486_s27, 4  ;;  %s1843_s0 = scalar_lea.sflag [#allocation5], %s486_s27 }
 0x7d0   : > { %1077 = vperm.xlu1 %1456, %v1074_v10  }
 0x7d1   : > { %1066 = vrot.lane.b32.xlu0 %v1064_v11, %s1565_s23  ;;  %s488_s23 = scalar_lea.vmem [#allocation4], %s1284_s16  ;;  %s1485_s16 = sshll.u32 %s1567_s22, 4  ;;  %s1486_s16 = int_to_ptr.vmem [resolvable:$false] %s1485_s16 }
 0x7d2   : > { %s1218_s1 = sshll.u32 %s488_s23, 4  ;;  %s1836_s1 = int_to_ptr.vmem [resolvable:$true] %s1218_s1 }
 0x7d3   : > { %s1481_s3 = scalar_lea.vmem %s1836_s1, 256  ;;  %p1488_p0 = scmp.lt.s32.totalorder %s1836_s1, %s1486_s16 }
 0x7d4   : > { %p1482_p11 = scmp.ne.s32.totalorder %s1836_s1, %s1481_s3 }
 0x7d5   : > { %1146 = vperm.xlu0 %1457, %v1143_v12  }
 0x7d6   : > { %p1483_p12 = pnand %p1482_p11, %p1688_p5 }
 0x7d8   : > { %p1484_p13 = pneg %p1483_p12 }
 0x83a   : > { %v1055_v13 = vpop.permute.xlu1 %1054 }
 0x83b   : > { %v1043_v14 = vpop.permute.xlu0 %1042  ;;  %1057 = vst.msk [vmem:[#allocation2] sm:$0xf] %vm707_vm11, %v1055_v13 }
 0x83c   : > { %1045 = vst.msk [vmem:[#allocation2 + $0x4] sm:$0xf] %vm678_vm9, %v1043_v14 }
 0x83e   : > { %v1049_v15 = vpop.permute.xlu1 %1048 }
 0x83f   : > { %v1061_v16 = vpop.permute.xlu0 %1060  ;;  %1051 = vst.msk [vmem:[#allocation2 + $0x8] sm:$0xf] %vm678_vm9, %v1049_v15 }
 0x840   : > { %1063 = vst.msk [vmem:[#allocation2 + $0x4] sm:$0xf] %vm707_vm11, %v1061_v16 }
 0x843   : > { %v1067_v17 = vpop.permute.xlu0 %1066 }
 0x844   : > { %1069 = vst.msk [vmem:[#allocation2 + $0x8] sm:$0xf] %vm707_vm11, %v1067_v17 }
 0x847   : > { %v1467_v18 = vld [vmem:[#allocation2] sm:$0xff]  }
 0x848   : > { %1380 = vmatpush3.bf16.msra.mxu1 %v1467_v18 }
 0x849   : > { %1381 = vmatprep.subr.bf16.mxu1 %v1548_v9 }
 0x84b   : > { %v1468_v19 = vld [vmem:[#allocation2 + $0x8] ss:$0 sps:$4 sm:$0xff]  }
 0x84c   : > { %v1093_v20 = vsel %vm744_vm12, %v1468_v19, 0 }
 0x84d   : > { %1382 = vmatpush3.bf16.msra.mxu1 %v1093_v20 }
 0x84f   : > { %v1078_v22 = vpop.permute.xlu1 %1077 }
 0x850   : > { %1384 = vmatmul.mubr.msk.bf16.vlgmr.msra.gmra.mrb[8].mxu1 %vm740_vm13, %v1070_v21 }
 0x854   : > { %v1147_v35 = vpop.permute.xlu0 %1146 }
 0x923   : > { %v1129_v23 = vpop.f32.mrb[8].mxu1 }
 0x924   : > { %v1130_v24 = vadd.f32 %v1129_v23, %v1078_v22  ;;  %v1385_v25 = vpop.f32.mrb[9].mxu1 }
 0x925   : > { %v1132_v26 = vpop.f32.mrb[10].mxu1 }
 0x926   : > { %v1136_v27 = vmin.f32 %v1130_v24, 0.0  ;;  %v1386_v28 = vpop.f32.mrb[11].mxu1  ;;  %vm1135_vm1 = vcmp.gt.f32.partialorder %v1130_v24, 0.0 }
 0x928   : > { %v1137_v29 = vmul.f32 1.442695, %v1136_v27 }
 0x92a   : > { %1479 = vpow2.f32 %v1137_v29 }
 0x934   : > { %v1480_v9 = vpop.eup %1479 }
 0x935   : > { %v1316_v30 = vadd.f32 -1.0, %v1480_v9 }
 0x937   : > { %v1140_v31 = vsel %vm1135_vm1, %v1130_v24, %v1316_v30 }
 0x938   : > { %v1142_v32 = vpack.c.bf16 %v1140_v31, %v1140_v31 }
 0x93a   : > { %v1153_v33 = vsel %vm744_vm12, %v1142_v32, 0 }
 0x93b   : > { %1388 = vmatpush3.bf16.msra.mxu0 %v1153_v33 }
 0x93e   : > { %1390 = vmatmul.mubr.msk.bf16.vlgmr.msra.gmra.mrb[12].mxu0 %vm802_vm15, %v1141_v34 }
 0xa11   : > { %v1189_v36 = vpop.f32.mrb[12].mxu0 }
 0xa12   : > { %v1190_v37 = vadd.f32 %v1189_v36, %v1147_v35  ;;  %v1391_v38 = vpop.f32.mrb[13].mxu0 }
 0xa13   : > { %v1192_v39 = vpop.f32.mrb[14].mxu0 }
 0xa14   : > { %v1195_v40 = vadd.f32 %v1190_v37, %v1801_v1  ;;  %v1392_v41 = vpop.f32.mrb[15].mxu0 }
 0xa16   : > { %1199 = vrot.lane.b32.xlu1 %v1195_v40, %s1566_s30  ;;  %1197 = vst.msk [vmem:[%s488_s23] sm:$0xff] %vm1196_vm4, %v1195_v40  ;;  %s1487_s30 = scalar_lea.vmem %s1486_s16, 512 }
 0xa17   : > { %p1489_p1 = scmp.lt.s32.totalorder %s1487_s30, %s1481_s3 }
 0xa19   : > { %p1490_p2 = por %p1489_p1, %p1488_p0 }
 0xa1b   : > { %p1491_p3 = pnand %p1490_p2, %p1484_p13 }
 0xa88   : > { %v1200_v42 = vpop.permute.xlu1 %1199 }
 0xa89   : > { %1318 = vst.msk [vmem:[%s488_s23 + $0x8] sm:$0xff] %vm1196_vm4, %v1200_v42 }
 0xa8a   : > { %1494 = shalt.err (!%p1491_p3)
}
 0xa8b   : > { %s1495_s27 = scalar_lea.hbm %s1841_s17, 256  ;;  %s1499_s25 = scalar_lea.hbm %s1899_s15, 512 }
 0xa8c   : > { %p1496_p4 = scmp.ne.s32.totalorder %s1841_s17, %s1495_s27  ;;  %p1500_p9 = scmp.lt.u32.totalorder %s1841_s17, %s1899_s15 }
 0xa8d   : > { %p1501_p10 = scmp.lt.u32.totalorder %s1499_s25, %s1495_s27  ;;  %p1503_p12 = scmp.lt.u32.totalorder %s1495_s27, %s1841_s17 }
 0xa8e   : > { %p1497_p7 = pnand %p1496_p4, %p1688_p5 }
 0xa8f   : > { %p1502_p11 = por %p1501_p10, %p1500_p9 }
 0xa90   : > { %p1498_p8 = pneg %p1497_p7 }
 0xa91   : > { %p1504_p13 = por %p1503_p12, %p1502_p11 }
 0xa93   : > { %p1505_p0 = pnand %p1504_p13, %p1498_p8 }
 0xa95   : > { %1508 = shalt.err (!%p1505_p0)
}
 0xa96   : > { %s1568_s3 = smov 128   ;;  %s1569_s16 = smov 8  }
 0xa97   : > { %1393 = dma.vmem_to_hbm [thread:$0]  (%p1688_p5), %s1836_s1, 256, %s1841_s17, %s1843_s0, %s1568_s3, %s1568_s3, %s1569_s16  }
 0xa98 PF: > { %p1399_p1 = scmp.ge.s32.totalorder %s1543_s21, 2  ;;  %s1233_s30 = sand.u32 1, %s1531_s18  }
 0xa99   : > { %s1234_s27 = scalar_lea.sflag [#allocation5], %s1233_s30 }
 0xa9a   : > { %p1396_p2 = pnand %p1399_p1, %p1692_p6 }
 0xa9c   : > { %1526 = dma.done.wait (!%p1396_p2), %s1234_s27, 256  }
 0xa9d   : > { %1528 = vsyncadd (!%p1396_p2), %s1234_s27, 4294967040  ;;  %s1919_s23 = sld [smem:[#allocation7_spill]]  ;;  %p25_p3 = scmp.ge.s32.totalorder %s1675_s24, 4  }
 0xa9e   : > { %s1920_s18 = smov %s1535_s19  ;;  %s1921_s19 = smov %s1539_s20 }
 0xa9f   : > { %s1923_s21 = smov %s1675_s24  ;;  %27 = sbr.rel (!%p25_p3) target bundleno = 8 (0x8), region = 117 }
 0xaa3   : > { %s1922_s20 = smov %s1919_s23 }
 0xaa6   :  { %1239 = vsyncpa [#allocation5], 1 }
 0xaa7   :  { %1241 = vsyncpa [#allocation5 + $0x1], 1 }

</bundles_post_ra>
